<compile_context>
chip_gen: v5e
topology: v5e:2x2
jax: 0.10.0
libtpu: 0.0.40
codegen_flags: <defaults>
</compile_context>

<pallas_src>
import functools

import numpy as np

import jax
import jax.numpy as jnp
from jax.experimental import pallas as pl
from jax.experimental.pallas import tpu as pltpu

KH = KW = 5  # LeNet conv kernel size


# ---------------------------------------------------------------------------
# The fused per-image kernel
# ---------------------------------------------------------------------------
def _lenet_kernel(x_ref, w1_ref, b1_ref, p1_ref, s1_ref,
                  w2_ref, b2_ref, p2_ref, s2_ref,
                  vfc1_ref, bfc1_ref, wfc2_ref, bfc2_ref,
                  wfc3_ref, bfc3_ref, out_ref):
    dot = functools.partial(jnp.dot, preferred_element_type=jnp.float32)
    x = x_ref[...]                                                    # (32, 3*32)

    # ---- conv1 + bias + ReLU: one accumulating matmul over stacked bands ----
    lhs1 = jnp.concatenate([x[i:i + 28, :] for i in range(KH)], axis=1)    # (28, 480)
    c1 = jnp.maximum(dot(lhs1, w1_ref[...]) + b1_ref[...], 0.0)            # (28, 6*28)

    # ---- maxpool1: row-max first (VPU), then 2 column-select matmuls ----
    rmax1 = jnp.maximum(dot(p1_ref[0], c1), dot(p1_ref[1], c1))            # (14, 168)
    pool1 = jnp.maximum(dot(rmax1, s1_ref[0]), dot(rmax1, s1_ref[1]))      # (14, 6*14)

    # ---- conv2 + bias + ReLU ----
    lhs2 = jnp.concatenate([pool1[i:i + 10, :] for i in range(KH)], axis=1)  # (10, 420)
    c2 = jnp.maximum(dot(lhs2, w2_ref[...]) + b2_ref[...], 0.0)            # (10, 16*10)

    # ---- maxpool2 ----
    rmax2 = jnp.maximum(dot(p2_ref[0], c2), dot(p2_ref[1], c2))            # (5, 160)
    pool2 = jnp.maximum(dot(rmax2, s2_ref[0]), dot(rmax2, s2_ref[1]))      # (5, 16*5)

    # ---- fc1: lane-concat flatten, torch's NCHW order folded into vfc1 ----
    flat = jnp.concatenate([pool2[r:r + 1, :] for r in range(5)], axis=1)  # (1, 400)
    h1 = jnp.maximum(dot(flat, vfc1_ref[...]) + bfc1_ref[...], 0.0)        # (1, 120)

    # ---- fc2 / fc3 ----
    h2 = jnp.maximum(dot(h1, wfc2_ref[...]) + bfc2_ref[...], 0.0)          # (1, 84)
    out_ref[...] = dot(h2, wfc3_ref[...]) + bfc3_ref[...]                  # (1, 10)


# ---------------------------------------------------------------------------
# One-time weight / selection-matrix packing (plain numpy, outside hot path)
# ---------------------------------------------------------------------------
def _banded_conv_weight_stacked(w, in_w, out_w):
    """(Cout,Cin,KH,KW) torch conv weight -> (KH*Cin*in_w, Cout*out_w) banded
    matrix; shift-i block at rows [i*Cin*in_w, (i+1)*Cin*in_w)."""
    w = np.asarray(w, np.float32)
    cout, cin, kh, kw = w.shape
    big = np.zeros((kh, cin * in_w, cout * out_w), np.float32)
    rows0 = np.arange(cin) * in_w
    cols0 = np.arange(cout) * out_w
    for i in range(kh):
        for j in range(kw):
            for ww in range(out_w):
                big[i, (rows0 + ww + j)[:, None], (cols0 + ww)[None, :]] = \
                    w[:, :, i, j].T
    return big.reshape(kh * cin * in_w, cout * out_w)


def _pool_row_select(h_conv):
    """(2, h_conv//2, h_conv) 0/1 matrices picking even/odd conv rows."""
    ph = h_conv // 2
    sel = np.zeros((2, ph, h_conv), np.float32)
    for d in range(2):
        for r in range(ph):
            sel[d, r, 2 * r + d] = 1.0
    return sel


def _pool_col_select(cout, w_out):
    """(2, cout*w_out, cout*w_out//2) 0/1 matrices picking even/odd conv cols."""
    pw = w_out // 2
    sel = np.zeros((2, cout * w_out, cout * pw), np.float32)
    for d in range(2):
        for c in range(cout):
            for q in range(pw):
                sel[d, c * w_out + 2 * q + d, c * pw + q] = 1.0
    return sel


def pack_params(p):
    """Repack PyTorch-layout LeNet params into the fused-kernel layout (once).
    Nothing here depends on the batch size."""
    fc1 = np.asarray(p["fc1_w"], np.float32)                        # (120, 400)
    # Fold torch's view(-1, 16*5*5) (index c*25+h*5+w) into fc1 weights so the
    # in-kernel flatten order (h*80 + c*5 + w) is matched.
    vfc1 = fc1.reshape(120, 16, 5, 5).transpose(2, 1, 3, 0).reshape(400, 120)
    packed = dict(
        w1=_banded_conv_weight_stacked(p["conv1_w"], in_w=32, out_w=28),  # (480, 168)
        b1=np.repeat(np.asarray(p["conv1_b"], np.float32), 28)[None, :],  # (1, 168)
        p1=_pool_row_select(28),                                          # (2, 14, 28)
        s1=_pool_col_select(6, 28),                                       # (2, 168, 84)
        w2=_banded_conv_weight_stacked(p["conv2_w"], in_w=14, out_w=10),  # (420, 160)
        b2=np.repeat(np.asarray(p["conv2_b"], np.float32), 10)[None, :],  # (1, 160)
        p2=_pool_row_select(10),                                          # (2, 5, 10)
        s2=_pool_col_select(16, 10),                                      # (2, 160, 80)
        vfc1=vfc1,                                                        # (400, 120)
        bfc1=np.asarray(p["fc1_b"], np.float32)[None, :],
        wfc2=np.asarray(p["fc2_w"], np.float32).T,                        # (120, 84)
        bfc2=np.asarray(p["fc2_b"], np.float32)[None, :],
        wfc3=np.asarray(p["fc3_w"], np.float32).T,                        # (84, 10)
        bfc3=np.asarray(p["fc3_b"], np.float32)[None, :],
    )
    return {k: jnp.asarray(a) for k, a in packed.items()}


# ---------------------------------------------------------------------------
# Forward pass: one fused pallas_call with a batch-parallel grid
# ---------------------------------------------------------------------------
def _whole_array_spec(a):
    """Full-shape block with a constant index map: DMA'd once, resident."""
    nd = a.ndim
    return pl.BlockSpec(tuple(a.shape), lambda b, _nd=nd: (0,) * _nd)


def lenet_forward(x_nchw, packed):
    n, c, h, w = x_nchw.shape
    assert (c, h, w) == (3, 32, 32), "LeNet expects 3x32x32 inputs"
    # NCHW -> (N, H, C*W): the only per-call glue op outside the kernel.
    x3d = jnp.transpose(x_nchw, (0, 2, 1, 3)).reshape(n, 32, 3 * 32)

    args = (x3d, packed["w1"], packed["b1"], packed["p1"], packed["s1"],
            packed["w2"], packed["b2"], packed["p2"], packed["s2"],
            packed["vfc1"], packed["bfc1"], packed["wfc2"], packed["bfc2"],
            packed["wfc3"], packed["bfc3"])

    per_img_flops = 2 * (
        28 * 480 * 168 + 2 * 14 * 28 * 168 + 2 * 14 * 168 * 84
        + 10 * 420 * 160 + 2 * 5 * 10 * 160 + 2 * 5 * 160 * 80
        + 400 * 120 + 120 * 84 + 84 * 10)
    weight_bytes = sum(int(np.prod(a.shape)) * 4 for a in args[1:])
    bytes_accessed = n * (32 * 96 + 10) * 4 + weight_bytes

    in_specs = [pl.BlockSpec((None, 32, 96), lambda b: (b, 0, 0))]
    in_specs += [_whole_array_spec(a) for a in args[1:]]

    out = pl.pallas_call(
        _lenet_kernel,
        out_shape=jax.ShapeDtypeStruct((n, 1, 10), jnp.float32),
        grid=(n,),
        in_specs=in_specs,
        out_specs=pl.BlockSpec((None, 1, 10), lambda b: (b, 0, 0)),
        compiler_params=pltpu.CompilerParams(
            dimension_semantics=("parallel",)),
        cost_estimate=pl.CostEstimate(flops=n * per_img_flops,
                                      transcendentals=0,
                                      bytes_accessed=bytes_accessed),
    )(*args)
    return out.reshape(n, 10)


# ---------------------------------------------------------------------------
# Param init (PyTorch default U(-1/sqrt(fan_in), 1/sqrt(fan_in))), reference
# ---------------------------------------------------------------------------
def init_params(key):
    def u(k, shape, fan_in):
        bound = 1.0 / np.sqrt(float(fan_in))
        return jax.random.uniform(k, shape, jnp.float32, -bound, bound)

    ks = jax.random.split(key, 10)
    return {
        "conv1_w": u(ks[0], (6, 3, 5, 5), 3 * 5 * 5),
        "conv1_b": u(ks[1], (6,), 3 * 5 * 5),
        "conv2_w": u(ks[2], (16, 6, 5, 5), 6 * 5 * 5),
        "conv2_b": u(ks[3], (16,), 6 * 5 * 5),
        "fc1_w": u(ks[4], (120, 400), 400),
        "fc1_b": u(ks[5], (120,), 400),
        "fc2_w": u(ks[6], (84, 120), 120),
        "fc2_b": u(ks[7], (84,), 120),
        "fc3_w": u(ks[8], (10, 84), 84),
        "fc3_b": u(ks[9], (10,), 84),
    }


def lenet_reference(x, p):
    """Plain-JAX/XLA reference with the exact semantics of the torch module."""
    dn = ("NCHW", "OIHW", "NCHW")
    hi = jax.lax.Precision.HIGHEST
    y = jax.lax.conv_general_dilated(x, p["conv1_w"], (1, 1), "VALID",
                                     dimension_numbers=dn, precision=hi)
    y = jax.nn.relu(y + p["conv1_b"][None, :, None, None])
    y = jax.lax.reduce_window(y, -jnp.inf, jax.lax.max,
                              (1, 1, 2, 2), (1, 1, 2, 2), "VALID")
    y = jax.lax.conv_general_dilated(y, p["conv2_w"], (1, 1), "VALID",
                                     dimension_numbers=dn, precision=hi)
    y = jax.nn.relu(y + p["conv2_b"][None, :, None, None])
    y = jax.lax.reduce_window(y, -jnp.inf, jax.lax.max,
                              (1, 1, 2, 2), (1, 1, 2, 2), "VALID")
    y = y.reshape(y.shape[0], -1)                               # torch view(-1, 400)
    y = jax.nn.relu(jnp.dot(y, p["fc1_w"].T, precision=hi) + p["fc1_b"])
    y = jax.nn.relu(jnp.dot(y, p["fc2_w"].T, precision=hi) + p["fc2_b"])
    return jnp.dot(y, p["fc3_w"].T, precision=hi) + p["fc3_b"]


if __name__ == "__main__":
    key = jax.random.PRNGKey(0)
    k_x, k_p = jax.random.split(key)
    # LeNet's 16*5*5 flatten requires 3x32x32 inputs; batch kept small.
    x = jax.random.normal(k_x, (2, 3, 32, 32), dtype=jnp.float32)
    params = init_params(k_p)
    packed = pack_params(params)      # one-time, batch-independent repacking

    fwd = jax.jit(lenet_forward)
    out = jax.block_until_ready(fwd(x, packed))
    assert out.shape == (2, 10) and out.dtype == jnp.float32

    ref = jax.block_until_ready(lenet_reference(x, params))
    np.testing.assert_allclose(np.asarray(out), np.asarray(ref),
                               rtol=2e-3, atol=2e-3)
    print("KERNEL_OK")
</pallas_src>

<mosaic_0001>
module attributes {stable_mosaic.version = 11 : i64} {
  func.func @_lenet_kernel(%arg0: i32, %arg1: memref<1x32x96xf32, #tpu.memory_space<vmem>>, %arg2: memref<480x168xf32, #tpu.memory_space<vmem>>, %arg3: memref<1x168xf32, #tpu.memory_space<vmem>>, %arg4: memref<2x14x28xf32, #tpu.memory_space<vmem>>, %arg5: memref<2x168x84xf32, #tpu.memory_space<vmem>>, %arg6: memref<420x160xf32, #tpu.memory_space<vmem>>, %arg7: memref<1x160xf32, #tpu.memory_space<vmem>>, %arg8: memref<2x5x10xf32, #tpu.memory_space<vmem>>, %arg9: memref<2x160x80xf32, #tpu.memory_space<vmem>>, %arg10: memref<400x120xf32, #tpu.memory_space<vmem>>, %arg11: memref<1x120xf32, #tpu.memory_space<vmem>>, %arg12: memref<120x84xf32, #tpu.memory_space<vmem>>, %arg13: memref<1x84xf32, #tpu.memory_space<vmem>>, %arg14: memref<84x10xf32, #tpu.memory_space<vmem>>, %arg15: memref<1x10xf32, #tpu.memory_space<vmem>>, %arg16: memref<1x1x10xf32, #tpu.memory_space<vmem>>) attributes {dimension_semantics = [#tpu.dimension_semantics<parallel>], iteration_bounds = array<i64: 2>, scalar_prefetch = 0 : i64, scratch_operands = 0 : i64, tpu.core_type = #tpu.core_type<tc>, window_params = [{transform_indices = @transform_0, window_bounds = array<i64: 1, 32, 96>}, {pipeline_mode = #tpu.pipeline_mode<synchronous>, transform_indices = @transform_1, window_bounds = array<i64: 480, 168>}, {pipeline_mode = #tpu.pipeline_mode<synchronous>, transform_indices = @transform_2, window_bounds = array<i64: 1, 168>}, {pipeline_mode = #tpu.pipeline_mode<synchronous>, transform_indices = @transform_3, window_bounds = array<i64: 2, 14, 28>}, {pipeline_mode = #tpu.pipeline_mode<synchronous>, transform_indices = @transform_4, window_bounds = array<i64: 2, 168, 84>}, {pipeline_mode = #tpu.pipeline_mode<synchronous>, transform_indices = @transform_5, window_bounds = array<i64: 420, 160>}, {pipeline_mode = #tpu.pipeline_mode<synchronous>, transform_indices = @transform_6, window_bounds = array<i64: 1, 160>}, {pipeline_mode = #tpu.pipeline_mode<synchronous>, transform_indices = @transform_7, window_bounds = array<i64: 2, 5, 10>}, {pipeline_mode = #tpu.pipeline_mode<synchronous>, transform_indices = @transform_8, window_bounds = array<i64: 2, 160, 80>}, {pipeline_mode = #tpu.pipeline_mode<synchronous>, transform_indices = @transform_9, window_bounds = array<i64: 400, 120>}, {pipeline_mode = #tpu.pipeline_mode<synchronous>, transform_indices = @transform_10, window_bounds = array<i64: 1, 120>}, {pipeline_mode = #tpu.pipeline_mode<synchronous>, transform_indices = @transform_11, window_bounds = array<i64: 120, 84>}, {pipeline_mode = #tpu.pipeline_mode<synchronous>, transform_indices = @transform_12, window_bounds = array<i64: 1, 84>}, {pipeline_mode = #tpu.pipeline_mode<synchronous>, transform_indices = @transform_13, window_bounds = array<i64: 84, 10>}, {pipeline_mode = #tpu.pipeline_mode<synchronous>, transform_indices = @transform_14, window_bounds = array<i64: 1, 10>}, {transform_indices = @transform_15, window_bounds = array<i64: 1, 1, 10>}]} {
    %c0 = arith.constant 0 : index
    %c0_0 = arith.constant 0 : index
    %c0_1 = arith.constant 0 : index
    %0 = vector.load %arg1[%c0, %c0_0, %c0_1] : memref<1x32x96xf32, #tpu.memory_space<vmem>>, vector<1x32x96xf32>
    %1 = vector.shape_cast %0 : vector<1x32x96xf32> to vector<32x96xf32>
    %2 = vector.extract_strided_slice %1 {offsets = [0, 0], sizes = [28, 96], strides = [1, 1]} : vector<32x96xf32> to vector<28x96xf32>
    %3 = vector.extract_strided_slice %1 {offsets = [1, 0], sizes = [28, 96], strides = [1, 1]} : vector<32x96xf32> to vector<28x96xf32>
    %4 = vector.extract_strided_slice %1 {offsets = [2, 0], sizes = [28, 96], strides = [1, 1]} : vector<32x96xf32> to vector<28x96xf32>
    %5 = vector.extract_strided_slice %1 {offsets = [3, 0], sizes = [28, 96], strides = [1, 1]} : vector<32x96xf32> to vector<28x96xf32>
    %6 = vector.extract_strided_slice %1 {offsets = [4, 0], sizes = [28, 96], strides = [1, 1]} : vector<32x96xf32> to vector<28x96xf32>
    %7 = tpu.concatenate %2, %3, %4, %5, %6 in 1 : vector<28x96xf32>, vector<28x96xf32>, vector<28x96xf32>, vector<28x96xf32>, vector<28x96xf32> -> vector<28x480xf32>
    %c0_2 = arith.constant 0 : index
    %c0_3 = arith.constant 0 : index
    %8 = vector.load %arg2[%c0_2, %c0_3] : memref<480x168xf32, #tpu.memory_space<vmem>>, vector<480x168xf32>
    %cst = arith.constant dense<0.000000e+00> : vector<28x168xf32>
    %9 = tpu.matmul %7, %8, %cst {dimension_numbers = #tpu.dot_dimension_numbers<[1], [0], [0], [1], [0, 0, 1, 1], [], []>} : vector<28x480xf32>, vector<480x168xf32>, vector<28x168xf32> -> vector<28x168xf32>
    %c0_4 = arith.constant 0 : index
    %c0_5 = arith.constant 0 : index
    %10 = vector.load %arg3[%c0_4, %c0_5] : memref<1x168xf32, #tpu.memory_space<vmem>>, vector<1x168xf32>
    %11 = vector.broadcast %10 : vector<1x168xf32> to vector<28x168xf32>
    %12 = arith.addf %9, %11 : vector<28x168xf32>
    %cst_6 = arith.constant 0.000000e+00 : f32
    %13 = vector.broadcast %cst_6 : f32 to vector<28x168xf32>
    %14 = arith.maximumf %12, %13 : vector<28x168xf32>
    %c0_7 = arith.constant 0 : index
    %c0_8 = arith.constant 0 : index
    %c0_9 = arith.constant 0 : index
    %15 = vector.load %arg4[%c0_7, %c0_8, %c0_9] : memref<2x14x28xf32, #tpu.memory_space<vmem>>, vector<1x14x28xf32>
    %16 = vector.shape_cast %15 : vector<1x14x28xf32> to vector<14x28xf32>
    %cst_10 = arith.constant dense<0.000000e+00> : vector<14x168xf32>
    %17 = tpu.matmul %16, %14, %cst_10 {dimension_numbers = #tpu.dot_dimension_numbers<[1], [0], [0], [1], [0, 0, 1, 1], [], []>} : vector<14x28xf32>, vector<28x168xf32>, vector<14x168xf32> -> vector<14x168xf32>
    %c1 = arith.constant 1 : index
    %c0_11 = arith.constant 0 : index
    %c0_12 = arith.constant 0 : index
    %18 = vector.load %arg4[%c1, %c0_11, %c0_12] : memref<2x14x28xf32, #tpu.memory_space<vmem>>, vector<1x14x28xf32>
    %19 = vector.shape_cast %18 : vector<1x14x28xf32> to vector<14x28xf32>
    %cst_13 = arith.constant dense<0.000000e+00> : vector<14x168xf32>
    %20 = tpu.matmul %19, %14, %cst_13 {dimension_numbers = #tpu.dot_dimension_numbers<[1], [0], [0], [1], [0, 0, 1, 1], [], []>} : vector<14x28xf32>, vector<28x168xf32>, vector<14x168xf32> -> vector<14x168xf32>
    %21 = arith.maximumf %17, %20 : vector<14x168xf32>
    %c0_14 = arith.constant 0 : index
    %c0_15 = arith.constant 0 : index
    %c0_16 = arith.constant 0 : index
    %22 = vector.load %arg5[%c0_14, %c0_15, %c0_16] : memref<2x168x84xf32, #tpu.memory_space<vmem>>, vector<1x168x84xf32>
    %23 = vector.shape_cast %22 : vector<1x168x84xf32> to vector<168x84xf32>
    %cst_17 = arith.constant dense<0.000000e+00> : vector<14x84xf32>
    %24 = tpu.matmul %21, %23, %cst_17 {dimension_numbers = #tpu.dot_dimension_numbers<[1], [0], [0], [1], [0, 0, 1, 1], [], []>} : vector<14x168xf32>, vector<168x84xf32>, vector<14x84xf32> -> vector<14x84xf32>
    %c1_18 = arith.constant 1 : index
    %c0_19 = arith.constant 0 : index
    %c0_20 = arith.constant 0 : index
    %25 = vector.load %arg5[%c1_18, %c0_19, %c0_20] : memref<2x168x84xf32, #tpu.memory_space<vmem>>, vector<1x168x84xf32>
    %26 = vector.shape_cast %25 : vector<1x168x84xf32> to vector<168x84xf32>
    %cst_21 = arith.constant dense<0.000000e+00> : vector<14x84xf32>
    %27 = tpu.matmul %21, %26, %cst_21 {dimension_numbers = #tpu.dot_dimension_numbers<[1], [0], [0], [1], [0, 0, 1, 1], [], []>} : vector<14x168xf32>, vector<168x84xf32>, vector<14x84xf32> -> vector<14x84xf32>
    %28 = arith.maximumf %24, %27 : vector<14x84xf32>
    %29 = vector.extract_strided_slice %28 {offsets = [0, 0], sizes = [10, 84], strides = [1, 1]} : vector<14x84xf32> to vector<10x84xf32>
    %30 = vector.extract_strided_slice %28 {offsets = [1, 0], sizes = [10, 84], strides = [1, 1]} : vector<14x84xf32> to vector<10x84xf32>
    %31 = vector.extract_strided_slice %28 {offsets = [2, 0], sizes = [10, 84], strides = [1, 1]} : vector<14x84xf32> to vector<10x84xf32>
    %32 = vector.extract_strided_slice %28 {offsets = [3, 0], sizes = [10, 84], strides = [1, 1]} : vector<14x84xf32> to vector<10x84xf32>
    %33 = vector.extract_strided_slice %28 {offsets = [4, 0], sizes = [10, 84], strides = [1, 1]} : vector<14x84xf32> to vector<10x84xf32>
    %34 = tpu.concatenate %29, %30, %31, %32, %33 in 1 : vector<10x84xf32>, vector<10x84xf32>, vector<10x84xf32>, vector<10x84xf32>, vector<10x84xf32> -> vector<10x420xf32>
    %c0_22 = arith.constant 0 : index
    %c0_23 = arith.constant 0 : index
    %35 = vector.load %arg6[%c0_22, %c0_23] : memref<420x160xf32, #tpu.memory_space<vmem>>, vector<420x160xf32>
    %cst_24 = arith.constant dense<0.000000e+00> : vector<10x160xf32>
    %36 = tpu.matmul %34, %35, %cst_24 {dimension_numbers = #tpu.dot_dimension_numbers<[1], [0], [0], [1], [0, 0, 1, 1], [], []>} : vector<10x420xf32>, vector<420x160xf32>, vector<10x160xf32> -> vector<10x160xf32>
    %c0_25 = arith.constant 0 : index
    %c0_26 = arith.constant 0 : index
    %37 = vector.load %arg7[%c0_25, %c0_26] : memref<1x160xf32, #tpu.memory_space<vmem>>, vector<1x160xf32>
    %38 = vector.broadcast %37 : vector<1x160xf32> to vector<10x160xf32>
    %39 = arith.addf %36, %38 : vector<10x160xf32>
    %cst_27 = arith.constant 0.000000e+00 : f32
    %40 = vector.broadcast %cst_27 : f32 to vector<10x160xf32>
    %41 = arith.maximumf %39, %40 : vector<10x160xf32>
    %c0_28 = arith.constant 0 : index
    %c0_29 = arith.constant 0 : index
    %c0_30 = arith.constant 0 : index
    %42 = vector.load %arg8[%c0_28, %c0_29, %c0_30] : memref<2x5x10xf32, #tpu.memory_space<vmem>>, vector<1x5x10xf32>
    %43 = vector.shape_cast %42 : vector<1x5x10xf32> to vector<5x10xf32>
    %cst_31 = arith.constant dense<0.000000e+00> : vector<5x160xf32>
    %44 = tpu.matmul %43, %41, %cst_31 {dimension_numbers = #tpu.dot_dimension_numbers<[1], [0], [0], [1], [0, 0, 1, 1], [], []>} : vector<5x10xf32>, vector<10x160xf32>, vector<5x160xf32> -> vector<5x160xf32>
    %c1_32 = arith.constant 1 : index
    %c0_33 = arith.constant 0 : index
    %c0_34 = arith.constant 0 : index
    %45 = vector.load %arg8[%c1_32, %c0_33, %c0_34] : memref<2x5x10xf32, #tpu.memory_space<vmem>>, vector<1x5x10xf32>
    %46 = vector.shape_cast %45 : vector<1x5x10xf32> to vector<5x10xf32>
    %cst_35 = arith.constant dense<0.000000e+00> : vector<5x160xf32>
    %47 = tpu.matmul %46, %41, %cst_35 {dimension_numbers = #tpu.dot_dimension_numbers<[1], [0], [0], [1], [0, 0, 1, 1], [], []>} : vector<5x10xf32>, vector<10x160xf32>, vector<5x160xf32> -> vector<5x160xf32>
    %48 = arith.maximumf %44, %47 : vector<5x160xf32>
    %c0_36 = arith.constant 0 : index
    %c0_37 = arith.constant 0 : index
    %c0_38 = arith.constant 0 : index
    %49 = vector.load %arg9[%c0_36, %c0_37, %c0_38] : memref<2x160x80xf32, #tpu.memory_space<vmem>>, vector<1x160x80xf32>
    %50 = vector.shape_cast %49 : vector<1x160x80xf32> to vector<160x80xf32>
    %cst_39 = arith.constant dense<0.000000e+00> : vector<5x80xf32>
    %51 = tpu.matmul %48, %50, %cst_39 {dimension_numbers = #tpu.dot_dimension_numbers<[1], [0], [0], [1], [0, 0, 1, 1], [], []>} : vector<5x160xf32>, vector<160x80xf32>, vector<5x80xf32> -> vector<5x80xf32>
    %c1_40 = arith.constant 1 : index
    %c0_41 = arith.constant 0 : index
    %c0_42 = arith.constant 0 : index
    %52 = vector.load %arg9[%c1_40, %c0_41, %c0_42] : memref<2x160x80xf32, #tpu.memory_space<vmem>>, vector<1x160x80xf32>
    %53 = vector.shape_cast %52 : vector<1x160x80xf32> to vector<160x80xf32>
    %cst_43 = arith.constant dense<0.000000e+00> : vector<5x80xf32>
    %54 = tpu.matmul %48, %53, %cst_43 {dimension_numbers = #tpu.dot_dimension_numbers<[1], [0], [0], [1], [0, 0, 1, 1], [], []>} : vector<5x160xf32>, vector<160x80xf32>, vector<5x80xf32> -> vector<5x80xf32>
    %55 = arith.maximumf %51, %54 : vector<5x80xf32>
    %56 = vector.extract_strided_slice %55 {offsets = [0, 0], sizes = [1, 80], strides = [1, 1]} : vector<5x80xf32> to vector<1x80xf32>
    %57 = vector.extract_strided_slice %55 {offsets = [1, 0], sizes = [1, 80], strides = [1, 1]} : vector<5x80xf32> to vector<1x80xf32>
    %58 = vector.extract_strided_slice %55 {offsets = [2, 0], sizes = [1, 80], strides = [1, 1]} : vector<5x80xf32> to vector<1x80xf32>
    %59 = vector.extract_strided_slice %55 {offsets = [3, 0], sizes = [1, 80], strides = [1, 1]} : vector<5x80xf32> to vector<1x80xf32>
    %60 = vector.extract_strided_slice %55 {offsets = [4, 0], sizes = [1, 80], strides = [1, 1]} : vector<5x80xf32> to vector<1x80xf32>
    %61 = tpu.concatenate %56, %57, %58, %59, %60 in 1 : vector<1x80xf32>, vector<1x80xf32>, vector<1x80xf32>, vector<1x80xf32>, vector<1x80xf32> -> vector<1x400xf32>
    %c0_44 = arith.constant 0 : index
    %c0_45 = arith.constant 0 : index
    %62 = vector.load %arg10[%c0_44, %c0_45] : memref<400x120xf32, #tpu.memory_space<vmem>>, vector<400x120xf32>
    %cst_46 = arith.constant dense<0.000000e+00> : vector<1x120xf32>
    %63 = tpu.matmul %61, %62, %cst_46 {dimension_numbers = #tpu.dot_dimension_numbers<[1], [0], [0], [1], [0, 0, 1, 1], [], []>} : vector<1x400xf32>, vector<400x120xf32>, vector<1x120xf32> -> vector<1x120xf32>
    %c0_47 = arith.constant 0 : index
    %c0_48 = arith.constant 0 : index
    %64 = vector.load %arg11[%c0_47, %c0_48] : memref<1x120xf32, #tpu.memory_space<vmem>>, vector<1x120xf32>
    %65 = arith.addf %63, %64 : vector<1x120xf32>
    %cst_49 = arith.constant 0.000000e+00 : f32
    %66 = vector.broadcast %cst_49 : f32 to vector<1x120xf32>
    %67 = arith.maximumf %65, %66 : vector<1x120xf32>
    %c0_50 = arith.constant 0 : index
    %c0_51 = arith.constant 0 : index
    %68 = vector.load %arg12[%c0_50, %c0_51] : memref<120x84xf32, #tpu.memory_space<vmem>>, vector<120x84xf32>
    %cst_52 = arith.constant dense<0.000000e+00> : vector<1x84xf32>
    %69 = tpu.matmul %67, %68, %cst_52 {dimension_numbers = #tpu.dot_dimension_numbers<[1], [0], [0], [1], [0, 0, 1, 1], [], []>} : vector<1x120xf32>, vector<120x84xf32>, vector<1x84xf32> -> vector<1x84xf32>
    %c0_53 = arith.constant 0 : index
    %c0_54 = arith.constant 0 : index
    %70 = vector.load %arg13[%c0_53, %c0_54] : memref<1x84xf32, #tpu.memory_space<vmem>>, vector<1x84xf32>
    %71 = arith.addf %69, %70 : vector<1x84xf32>
    %cst_55 = arith.constant 0.000000e+00 : f32
    %72 = vector.broadcast %cst_55 : f32 to vector<1x84xf32>
    %73 = arith.maximumf %71, %72 : vector<1x84xf32>
    %c0_56 = arith.constant 0 : index
    %c0_57 = arith.constant 0 : index
    %74 = vector.load %arg14[%c0_56, %c0_57] : memref<84x10xf32, #tpu.memory_space<vmem>>, vector<84x10xf32>
    %cst_58 = arith.constant dense<0.000000e+00> : vector<1x10xf32>
    %75 = tpu.matmul %73, %74, %cst_58 {dimension_numbers = #tpu.dot_dimension_numbers<[1], [0], [0], [1], [0, 0, 1, 1], [], []>} : vector<1x84xf32>, vector<84x10xf32>, vector<1x10xf32> -> vector<1x10xf32>
    %c0_59 = arith.constant 0 : index
    %c0_60 = arith.constant 0 : index
    %76 = vector.load %arg15[%c0_59, %c0_60] : memref<1x10xf32, #tpu.memory_space<vmem>>, vector<1x10xf32>
    %77 = arith.addf %75, %76 : vector<1x10xf32>
    %c0_61 = arith.constant 0 : index
    %c0_62 = arith.constant 0 : index
    %c0_63 = arith.constant 0 : index
    %78 = vector.load %arg16[%c0_61, %c0_62, %c0_63] : memref<1x1x10xf32, #tpu.memory_space<vmem>>, vector<1x1x10xf32>
    %79 = vector.shape_cast %78 : vector<1x1x10xf32> to vector<1x10xf32>
    %80 = vector.shape_cast %77 : vector<1x10xf32> to vector<1x1x10xf32>
    tpu.vector_store %arg16[%c0_61, %c0_62, %c0_63], %80 {strides = array<i32>} : memref<1x1x10xf32, #tpu.memory_space<vmem>>, vector<1x1x10xf32>,
    return
  }
  func.func @transform_0(%arg0: i32) -> (i32, i32, i32) {
    %c0_i32 = arith.constant 0 : i32
    %c0_i32_0 = arith.constant 0 : i32
    %c0_i32_1 = arith.constant 0 : i32
    return %arg0, %c0_i32, %c0_i32_0 : i32, i32, i32
  }
  func.func @transform_1(%arg0: i32) -> (i32, i32) {
    %c0_i32 = arith.constant 0 : i32
    %c0_i32_0 = arith.constant 0 : i32
    %c0_i32_1 = arith.constant 0 : i32
    return %c0_i32, %c0_i32_0 : i32, i32
  }
  func.func @transform_2(%arg0: i32) -> (i32, i32) {
    %c0_i32 = arith.constant 0 : i32
    %c0_i32_0 = arith.constant 0 : i32
    %c0_i32_1 = arith.constant 0 : i32
    return %c0_i32, %c0_i32_0 : i32, i32
  }
  func.func @transform_3(%arg0: i32) -> (i32, i32, i32) {
    %c0_i32 = arith.constant 0 : i32
    %c0_i32_0 = arith.constant 0 : i32
    %c0_i32_1 = arith.constant 0 : i32
    %c0_i32_2 = arith.constant 0 : i32
    return %c0_i32, %c0_i32_0, %c0_i32_1 : i32, i32, i32
  }
  func.func @transform_4(%arg0: i32) -> (i32, i32, i32) {
    %c0_i32 = arith.constant 0 : i32
    %c0_i32_0 = arith.constant 0 : i32
    %c0_i32_1 = arith.constant 0 : i32
    %c0_i32_2 = arith.constant 0 : i32
    return %c0_i32, %c0_i32_0, %c0_i32_1 : i32, i32, i32
  }
  func.func @transform_5(%arg0: i32) -> (i32, i32) {
    %c0_i32 = arith.constant 0 : i32
    %c0_i32_0 = arith.constant 0 : i32
    %c0_i32_1 = arith.constant 0 : i32
    return %c0_i32, %c0_i32_0 : i32, i32
  }
  func.func @transform_6(%arg0: i32) -> (i32, i32) {
    %c0_i32 = arith.constant 0 : i32
    %c0_i32_0 = arith.constant 0 : i32
    %c0_i32_1 = arith.constant 0 : i32
    return %c0_i32, %c0_i32_0 : i32, i32
  }
  func.func @transform_7(%arg0: i32) -> (i32, i32, i32) {
    %c0_i32 = arith.constant 0 : i32
    %c0_i32_0 = arith.constant 0 : i32
    %c0_i32_1 = arith.constant 0 : i32
    %c0_i32_2 = arith.constant 0 : i32
    return %c0_i32, %c0_i32_0, %c0_i32_1 : i32, i32, i32
  }
  func.func @transform_8(%arg0: i32) -> (i32, i32, i32) {
    %c0_i32 = arith.constant 0 : i32
    %c0_i32_0 = arith.constant 0 : i32
    %c0_i32_1 = arith.constant 0 : i32
    %c0_i32_2 = arith.constant 0 : i32
    return %c0_i32, %c0_i32_0, %c0_i32_1 : i32, i32, i32
  }
  func.func @transform_9(%arg0: i32) -> (i32, i32) {
    %c0_i32 = arith.constant 0 : i32
    %c0_i32_0 = arith.constant 0 : i32
    %c0_i32_1 = arith.constant 0 : i32
    return %c0_i32, %c0_i32_0 : i32, i32
  }
  func.func @transform_10(%arg0: i32) -> (i32, i32) {
    %c0_i32 = arith.constant 0 : i32
    %c0_i32_0 = arith.constant 0 : i32
    %c0_i32_1 = arith.constant 0 : i32
    return %c0_i32, %c0_i32_0 : i32, i32
  }
  func.func @transform_11(%arg0: i32) -> (i32, i32) {
    %c0_i32 = arith.constant 0 : i32
    %c0_i32_0 = arith.constant 0 : i32
    %c0_i32_1 = arith.constant 0 : i32
    return %c0_i32, %c0_i32_0 : i32, i32
  }
  func.func @transform_12(%arg0: i32) -> (i32, i32) {
    %c0_i32 = arith.constant 0 : i32
    %c0_i32_0 = arith.constant 0 : i32
    %c0_i32_1 = arith.constant 0 : i32
    return %c0_i32, %c0_i32_0 : i32, i32
  }
  func.func @transform_13(%arg0: i32) -> (i32, i32) {
    %c0_i32 = arith.constant 0 : i32
    %c0_i32_0 = arith.constant 0 : i32
    %c0_i32_1 = arith.constant 0 : i32
    return %c0_i32, %c0_i32_0 : i32, i32
  }
  func.func @transform_14(%arg0: i32) -> (i32, i32) {
    %c0_i32 = arith.constant 0 : i32
    %c0_i32_0 = arith.constant 0 : i32
    %c0_i32_1 = arith.constant 0 : i32
    return %c0_i32, %c0_i32_0 : i32, i32
  }
  func.func @transform_15(%arg0: i32) -> (i32, i32, i32) {
    %c0_i32 = arith.constant 0 : i32
    %c0_i32_0 = arith.constant 0 : i32
    %c0_i32_1 = arith.constant 0 : i32
    return %arg0, %c0_i32, %c0_i32_0 : i32, i32, i32
  }
}

</mosaic_0001>

<bundles_post_ra>
// kernel: lenet_forward.1
= control target key start
LH: loop header
LB: loop body
LE: loop exit
PB: predicated region body
PF: predicated region fallthrough
CT: control target
= control target key end

     0   :  { %s3882_s0 = inlined_call_operand.vmem [shape: f32[2,32,96], index: 0, kind: input, shape index: {}]   ;;  %s3883_s1 = inlined_call_operand.vmem [shape: f32[480,168], index: 1, kind: input, shape index: {}]   ;;  %s3884_s2 = inlined_call_operand.vmem [shape: f32[1,168], index: 2, kind: input, shape index: {}]   ;;  %s3885_s3 = inlined_call_operand.vmem [shape: f32[2,14,28], index: 3, kind: input, shape index: {}]   ;;  %s3886_s4 = inlined_call_operand.vmem [shape: f32[2,168,84], index: 4, kind: input, shape index: {}]   ;;  %s3887_s5 = inlined_call_operand.vmem [shape: f32[420,160], index: 5, kind: input, shape index: {}]   ;;  %s3888_s6 = inlined_call_operand.vmem [shape: f32[1,160], index: 6, kind: input, shape index: {}]   ;;  %s3889_s7 = inlined_call_operand.vmem [shape: f32[2,5,10], index: 7, kind: input, shape index: {}]   ;;  %s3890_s8 = inlined_call_operand.vmem [shape: f32[2,160,80], index: 8, kind: input, shape index: {}]   ;;  %s3891_s9 = inlined_call_operand.vmem [shape: f32[400,120], index: 9, kind: input, shape index: {}]   ;;  %s3892_s10 = inlined_call_operand.vmem [shape: f32[1,120], index: 10, kind: input, shape index: {}]   ;;  %s3893_s11 = inlined_call_operand.vmem [shape: f32[120,84], index: 11, kind: input, shape index: {}]   ;;  %s3894_s12 = inlined_call_operand.vmem [shape: f32[1,84], index: 12, kind: input, shape index: {}]   ;;  %s3895_s13 = inlined_call_operand.vmem [shape: f32[84,10], index: 13, kind: input, shape index: {}]   ;;  %s3896_s14 = inlined_call_operand.vmem [shape: f32[1,10], index: 14, kind: input, shape index: {}]   ;;  %s3897_s15 = inlined_call_operand.hbm [shape: f32[2,1,10], index: 15, kind: output, shape index: {}]  }
   0x1   :  { %3910 = sst [smem:[#allocation10_spill]] %s3882_s0 }
   0x2   :  { %20 = vsyncpa [#allocation3], 0 }
   0x3   :  { %22 = vsyncpa [#allocation3 + $0x1], 0  ;;  %s2417_s18 = smov 0   ;;  %s2419_s19 = smov 0  }
   0x4   :  { %s2421_s20 = smov 0   ;;  %s2423_s21 = smov 0  }
   0x5 LB: > { %3911 = sst [smem:[#allocation5_spill]] %s2315_s18  ;;  %s2438_s22 = sadd.s32 4294967295, %s2327_s21   ;;  %s2327_s21 = sphi %s2423_s21, %s3926_s21   ;;  %s2323_s20 = sphi %s2421_s20, %s3928_s20   ;;  %s2319_s19 = sphi %s2419_s19, %s3930_s19   ;;  %s2315_s18 = sphi %s2417_s18, %s3929_s18  }
   0x6   : > { %3912 = sst [smem:[#allocation6_spill]] %s2323_s20  ;;  %s2111_s23 = sadd.s32 4294967294, %s2327_s21  }
   0x7   : > { %s2442_s24 = sadd.s32 1, %s2327_s21   ;;  %s355_s25 = sadd.s32 1, %s2323_s20 }
   0x8   : > { %3913 = sst [smem:[#allocation7_spill]] %s2442_s24  ;;  %s352_s26 = ssub.s32 %s2327_s21, %s2442_s24 }
   0x9   : > { %p365_p0 = scmp.ne.s32.totalorder %s2323_s20, %s2319_s19  ;;  %p353_p1 = scmp.eq.s32.totalorder %s352_s26, 0 }
   0xa   : > { %p366_p2 = scmp.eq.s32.totalorder %s2438_s22, 1  ;;  %p371_p3 = scmp.ne.s32.totalorder %s2319_s19, %s2315_s18 }
   0xb   : > { %p372_p4 = scmp.eq.s32.totalorder %s2111_s23, 1  ;;  %p2114_p7 = scmp.ge.s32.totalorder %s2327_s21, 1 }
   0xc   : > { %s2453_s27 = scalar_select %p353_p1, %s2323_s20, %s355_s25  }
   0xd   : > { %p2455_p5 = por %p366_p2, %p365_p0  ;;  %p2459_p6 = por %p372_p4, %p371_p3 }
   0xe   : > { %3914 = sst [smem:[#allocation8_spill]] %s2453_s27  ;;  %p440_p8 = scmp.lt.s32.totalorder %s2327_s21, 3 }
   0xf   : > { %s3916_s29 = scalar_select %p2459_p6, 1, 0 }
  0x10   : > { %p441_p9 = pnand %p2114_p7, %p440_p8 }
  0x11   : > { %3917 = sst [smem:[#allocation9_spill]] %s3916_s29  ;;  %p487_p10 = scmp.lt.s32.totalorder (!%p441_p9), %s2438_s22, 1 }
  0x12   : > { %444 = sbr.rel (%p441_p9) target bundleno = 1731 (0x6c3), region = 80  ;;  %s3918_s0 = sld [smem:[#allocation10_spill]] (!%p441_p9) }
  0x13   : > { %s3901_s23 = smov (!%p441_p9), 96   ;;  %s3906_s27 = smov (!%p441_p9), 64  }
  0x14   : > { %s3920_s17 = smov (!%p441_p9), 96   ;;  %s3909_s24 = smov (!%p441_p9), 124  }
  0x15   : > { %s3908_s29 = smov (!%p441_p9), 40   ;;  %s3921_s26 = smov (!%p441_p9), 124  }
  0x16   : > { %s3922_s20 = smov (!%p441_p9), 40   ;;  %s2336_s18 = smov (!%p441_p9), 112  }
  0x17   : > { %s488_s30 = scalar_select %p487_p10, %s2438_s22, 1  ;;  %v701_v0 = vld [vmem:[%s3883_s1 + $0x3b0] sm:$0xff]  ;;  %v699_v1 = vld [vmem:[%s3883_s1 + $0x3a0] sm:$0xff]  ;;  %vm500_vm0 = vcmask 1046528   ;;  %vm520_vm1 = vcmask 1045504   ;;  %vm540_vm2 = vcmask 1044480  }
  0x18   : > { %808 = vmatpush.msra.mxu3 %v701_v0  ;;  %v697_v9 = vld [vmem:[%s3883_s1 + $0x390] sm:$0xff]  ;;  %v695_v14 = vld [vmem:[%s3883_s1 + $0x380] sm:$0xff]  ;;  %vm560_vm3 = vcmask 1043456   ;;  %vm568_vm4 = vcmask 785408   ;;  %v614_v60 = vld [vmem:[%s3883_s1 + $0xf8] sm:$0xff]  ;;  %vm573_vm5 = vcmask 523264  }
  0x19   : > { %s2207_s16 = sshll.u32 %s488_s30, 5  ;;  %v613_v15 = vld [vmem:[%s3883_s1 + $0xf0] sm:$0xff]  ;;  %v611_v17 = vld [vmem:[%s3883_s1 + $0xe0] sm:$0xff]  ;;  %s3903_s30 = smov 32   ;;  %v612_v0 = vld [vmem:[%s3883_s1 + $0xe8] sm:$0xff]  ;;  %vm578_vm6 = vcmask 261120  }
  0x1a   : > { %s2470_s25 = scalar_lea.vmem %s3918_s0, %s2207_s16  ;;  %809 = vmatpush.msra.mxu3 %v699_v1  ;;  %v693_v22 = vld [vmem:[%s3883_s1 + $0x370] sm:$0xff]  ;;  %717 = vmatpush.msra.mxu0 %v613_v15  ;;  %v691_v27 = vld [vmem:[%s3883_s1 + $0x360] sm:$0xff]  ;;  %s3919_s0 = smov 32   ;;  %vm959_vm7 = vcmask 228352   ;;  %vm1098_vm8 = vcmask 326656   ;;  %vm1259_vm9 = vcmask 687104  }
  0x1b   : > { %v2479_v2 = vld [vmem:[%s2470_s25] sm:$0xff]  ;;  %v2482_v3 = vld [vmem:[%s2470_s25 + $0x8] sm:$0xff]  ;;  %v2485_v4 = vld [vmem:[%s2470_s25 + $0x10] sm:$0xff]  ;;  %vm1382_vm10 = vcmask 293888   ;;  %vm1267_vm11 = vcmask 654336   ;;  %vm1264_vm12 = vcmask 1014784  }
  0x1c   : > { %v501_v5 = vrot.slane %v2479_v2, 1  ;;  %v502_v6 = vrot.slane %v2482_v3, 1  ;;  %v521_v7 = vrot.slane %v2479_v2, 2  ;;  %v522_v8 = vrot.slane %v2482_v3, 2  ;;  %810 = vmatpush.msra.mxu3 %v697_v9  ;;  %v645_v23 = vld [vmem:[%s3883_s1 + $0x1f0] sm:$0xff]  ;;  %v2521_v24 = vld [vmem:[%s2470_s25 + $0x18] sm:$0xff]  ;;  %718 = vmatpush.msra.mxu0 %v611_v17 }
  0x1d   : > { %v524_v10 = vrot.slane %v2485_v4, 2  ;;  %v504_v13 = vrot.slane %v2485_v4, 1  ;;  %v542_v19 = vrot.slane %v2482_v3, 3  ;;  %v544_v20 = vrot.slane %v2485_v4, 3  ;;  %v609_v25 = vld [vmem:[%s3883_s1 + $0xd0] sm:$0xff]  ;;  %v643_v28 = vld [vmem:[%s3883_s1 + $0x1e0] sm:$0xff]  ;;  %746 = vmatpush.msra.mxu1 %v645_v23 }
  0x1e   : > { %v503_v11 = vsel %vm500_vm0, %v501_v5, %v502_v6  ;;  %v523_v12 = vsel %vm520_vm1, %v521_v7, %v522_v8  ;;  %811 = vmatpush.msra.mxu3 %v695_v14  ;;  %v526_v26 = vrot.slane %v2521_v24, 2  ;;  %v541_v29 = vrot.slane %v2479_v2, 3  ;;  %v607_v30 = vld [vmem:[%s3883_s1 + $0xc0] sm:$0xff]  ;;  %v677_v31 = vld [vmem:[%s3883_s1 + $0x2f0] sm:$0xff]  ;;  %719 = vmatpush.msra.mxu0 %v609_v25  ;;  %v606_v14 = vld [vmem:[%s3883_s1 + $0xb8] sm:$0xff] }
  0x1f   : > { %508 = vrot.lane.b32.xlu1 %v503_v11, %s3901_s23  ;;  %v525_v16 = vsel %vm520_vm1, %v522_v8, %v524_v10  ;;  %v505_v21 = vsel %vm500_vm0, %v502_v6, %v504_v13  ;;  %v545_v32 = vsel %vm540_vm2, %v542_v19, %v544_v20  ;;  %v689_v33 = vld [vmem:[%s3883_s1 + $0x350] sm:$0xff]  ;;  %775 = vmatpush.msra.mxu2 %v677_v31  ;;  %v675_v34 = vld [vmem:[%s3883_s1 + $0x2e0] sm:$0xff]  ;;  %v506_v41 = vrot.slane %v2521_v24, 1  ;;  %v610_v8 = vld [vmem:[%s3883_s1 + $0xd8] sm:$0xff] }
  0x20   : > { %v2255_v18 = vpack.i.bf16 %v525_v16, %v523_v12  ;;  %510 = vrot.lane.b32.xlu2 %v505_v21, %s3901_s23  ;;  %812 = vmatpush.msra.mxu3 %v693_v22  ;;  %v605_v35 = vld [vmem:[%s3883_s1 + $0xb0] sm:$0xff]  ;;  %v527_v37 = vsel %vm520_vm1, %v524_v10, %v526_v26  ;;  %v687_v38 = vld [vmem:[%s3883_s1 + $0x340] sm:$0xff]  ;;  %v543_v39 = vsel %vm540_vm2, %v541_v29, %v542_v19  ;;  %v546_v48 = vrot.slane %v2521_v24, 3  ;;  %v608_v11 = vld [vmem:[%s3883_s1 + $0xc8] sm:$0xff]  ;;  %s2335_s23 = smov 80  }
  0x21   : > { %747 = vmatpush.msra.mxu1 %v643_v28  ;;  %v641_v36 = vld [vmem:[%s3883_s1 + $0x1d0] sm:$0xff]  ;;  %720 = vmatpush.msra.mxu0 %v607_v30  ;;  %v603_v40 = vld [vmem:[%s3883_s1 + $0xa0] sm:$0xff]  ;;  %v561_v49 = vrot.slane %v2479_v2, 4  ;;  %v562_v50 = vrot.slane %v2482_v3, 4  ;;  %v507_v53 = vsel %vm500_vm0, %v504_v13, %v506_v41  ;;  %v564_v5 = vrot.slane %v2485_v4, 4  ;;  %v602_v23 = vld [vmem:[%s3883_s1 + $0x98] sm:$0xff] }
  0x22   : > { %2256 = vrot.lane.b32.xlu0 %v2255_v18, %s3906_s27  ;;  %813 = vmatpush.msra.mxu3 %v691_v27  ;;  %v685_v42 = vld [vmem:[%s3883_s1 + $0x330] sm:$0xff]  ;;  %v639_v43 = vld [vmem:[%s3883_s1 + $0x1c0] sm:$0xff]  ;;  %v547_v58 = vsel %vm540_vm2, %v544_v20, %v546_v48  ;;  %v604_v18 = vld [vmem:[%s3883_s1 + $0xa8] sm:$0xff]  ;;  %v2696_v20 = vrot.slane %v2521_v24, 4  ;;  %vm1586_vm13 = vcmask 1041408   ;;  %vm1582_vm14 = vcmask 80896  }
  0x23   : > { %776 = vmatpush.msra.mxu2 %v675_v34  ;;  %721 = vmatpush.msra.mxu0 %v605_v35  ;;  %v601_v44 = vld [vmem:[%s3883_s1 + $0x90] sm:$0xff]  ;;  %v683_v46 = vld [vmem:[%s3883_s1 + $0x320] sm:$0xff]  ;;  %v2620_v59 = vsel %vm560_vm3, %v561_v49, %v562_v50  ;;  %v2672_v13 = vsel %vm560_vm3, %v562_v50, %v564_v5  ;;  %v600_v28 = vld [vmem:[%s3883_s1 + $0x88] sm:$0xff]  ;;  %vm1824_vm15 = vcmask 916480  }
  0x24   : > { %814 = vmatpush.msra.mxu3 %v689_v33  ;;  %748 = vmatpush.msra.mxu1 %v641_v36  ;;  %v673_v45 = vld [vmem:[%s3883_s1 + $0x2d0] sm:$0xff]  ;;  %v599_v51 = vld [vmem:[%s3883_s1 + $0x80] sm:$0xff]  ;;  %v2724_v30 = vsel %vm560_vm3, %v564_v5, %v2696_v20  ;;  %v598_v31 = vld [vmem:[%s3883_s1 + $0x78] sm:$0xff] }
  0x25   : > { %722 = vmatpush.msra.mxu0 %v603_v40  ;;  %v637_v47 = vld [vmem:[%s3883_s1 + $0x1b0] sm:$0xff]  ;;  %v671_v52 = vld [vmem:[%s3883_s1 + $0x2c0] sm:$0xff]  ;;  %777 = vmatpush.msra.mxu2 %v673_v45  ;;  %v594_v36 = vld [vmem:[%s3883_s1 + $0x58] sm:$0xff] }
  0x26   : > { %815 = vmatpush.msra.mxu3 %v687_v38  ;;  %749 = vmatpush.msra.mxu1 %v639_v43  ;;  %v681_v54 = vld [vmem:[%s3883_s1 + $0x310] sm:$0xff]  ;;  %v635_v55 = vld [vmem:[%s3883_s1 + $0x1a0] sm:$0xff]  ;;  %v646_v40 = vld [vmem:[%s3883_s1 + $0x1f8] sm:$0xff] }
  0x27   : > { %550 = vrot.lane.b32.xlu1 %v545_v32, %s3903_s30  ;;  %723 = vmatpush.msra.mxu0 %v601_v44  ;;  %v597_v56 = vld [vmem:[%s3883_s1 + $0x70] sm:$0xff]  ;;  %v679_v57 = vld [vmem:[%s3883_s1 + $0x300] sm:$0xff]  ;;  %v596_v32 = vld [vmem:[%s3883_s1 + $0x68] sm:$0xff]  ;;  %s485_s30 = sand.u32 1, %s2319_s19  }
  0x28   : > { %532 = vrot.lane.b32.xlu2 %v527_v37, %s3906_s27  ;;  %816 = vmatpush.msra.mxu3 %v685_v42  ;;  %v633_v61 = vld [vmem:[%s3883_s1 + $0x190] sm:$0xff]  ;;  %v595_v62 = vld [vmem:[%s3883_s1 + $0x60] sm:$0xff]  ;;  %v590_v43 = vld [vmem:[%s3883_s1 + $0x38] sm:$0xff]  ;;  %s2044_s16 = scalar_lea.sflag [#allocation3], %s485_s30 }
  0x29   : > { %750 = vmatpush.msra.mxu1 %v637_v47  ;;  %724 = vmatpush.msra.mxu0 %v599_v51  ;;  %v669_v63 = vld [vmem:[%s3883_s1 + $0x2b0] sm:$0xff]  ;;  %v631_v1 = vld [vmem:[%s3883_s1 + $0x180] sm:$0xff]  ;;  %v644_v44 = vld [vmem:[%s3883_s1 + $0x1e8] sm:$0xff] }
  0x2a   : > { %548 = vrot.lane.b32.xlu0 %v543_v39, %s3919_s0  ;;  %817 = vmatpush.msra.mxu3 %v683_v46  ;;  %v593_v6 = vld [vmem:[%s3883_s1 + $0x50] sm:$0xff]  ;;  %v667_v7 = vld [vmem:[%s3883_s1 + $0x2a0] sm:$0xff]  ;;  %v592_v39 = vld [vmem:[%s3883_s1 + $0x48] sm:$0xff] }
  0x2b   : > { %778 = vmatpush.msra.mxu2 %v671_v52  ;;  %751 = vmatpush.msra.mxu1 %v635_v55  ;;  %v629_v9 = vld [vmem:[%s3883_s1 + $0x170] sm:$0xff]  ;;  %v591_v10 = vld [vmem:[%s3883_s1 + $0x40] sm:$0xff]  ;;  %v588_v46 = vld [vmem:[%s3883_s1 + $0x28] sm:$0xff] }
  0x2c   : > { %818 = vmatpush.msra.mxu3 %v681_v54  ;;  %725 = vmatpush.msra.mxu0 %v597_v56  ;;  %v665_v12 = vld [vmem:[%s3883_s1 + $0x290] sm:$0xff]  ;;  %v627_v15 = vld [vmem:[%s3883_s1 + $0x160] sm:$0xff]  ;;  %v642_v47 = vld [vmem:[%s3883_s1 + $0x1d8] sm:$0xff] }
  0x2d   : > { %752 = vmatpush.msra.mxu1 %v633_v61  ;;  %779 = vmatpush.msra.mxu2 %v669_v63  ;;  %v589_v16 = vld [vmem:[%s3883_s1 + $0x30] sm:$0xff]  ;;  %v663_v17 = vld [vmem:[%s3883_s1 + $0x280] sm:$0xff]  ;;  %v586_v50 = vld [vmem:[%s3883_s1 + $0x18] sm:$0xff] }
  0x2e   : > { %819 = vmatpush.msra.mxu3 %v679_v57  ;;  %726 = vmatpush.msra.mxu0 %v595_v62  ;;  %v625_v19 = vld [vmem:[%s3883_s1 + $0x150] sm:$0xff]  ;;  %v587_v21 = vld [vmem:[%s3883_s1 + $0x20] sm:$0xff]  ;;  %v640_v51 = vld [vmem:[%s3883_s1 + $0x1c8] sm:$0xff] }
  0x2f   : > { %512 = vrot.lane.b32.xlu1 %v507_v53, %s3920_s17  ;;  %2117 = vmatmul.msk.f32.vlgmr.msra.gmra.mxu3 %vm568_vm4, %v2620_v59  ;;  %v661_v22 = vld [vmem:[%s3883_s1 + $0x270] sm:$0xff]  ;;  %v623_v25 = vld [vmem:[%s3883_s1 + $0x140] sm:$0xff]  ;;  %v676_v52 = vld [vmem:[%s3883_s1 + $0x2e8] sm:$0xff] }
  0x30   : > { %534 = vrot.lane.b32.xlu2 %v526_v26, %s3906_s27  ;;  %833 = vmatpush.msrb.mxu3 %v614_v60  ;;  %v585_v26 = vld [vmem:[%s3883_s1 + $0x10] sm:$0xff]  ;;  %v659_v27 = vld [vmem:[%s3883_s1 + $0x260] sm:$0xff]  ;;  %v584_v54 = vld [vmem:[%s3883_s1 + $0x8] sm:$0xff]  ;;  %s3923_s27 = smov 64  }
  0x31   : > { %753 = vmatpush.msra.mxu1 %v631_v1  ;;  %727 = vmatpush.msra.mxu0 %v593_v6  ;;  %v621_v29 = vld [vmem:[%s3883_s1 + $0x130] sm:$0xff]  ;;  %v583_v33 = vld [vmem:[%s3883_s1] sm:$0xff]  ;;  %v638_v55 = vld [vmem:[%s3883_s1 + $0x1b8] sm:$0xff] }
  0x32   : > { %552 = vrot.lane.b32.xlu0 %v547_v58, %s3919_s0  ;;  %834 = vmatpush.msrb.mxu3 %v612_v0  ;;  %v619_v34 = vld [vmem:[%s3883_s1 + $0x120] sm:$0xff]  ;;  %v657_v35 = vld [vmem:[%s3883_s1 + $0x250] sm:$0xff]  ;;  %v674_v56 = vld [vmem:[%s3883_s1 + $0x2d8] sm:$0xff] }
  0x33   : > { %780 = vmatpush.msra.mxu2 %v667_v7  ;;  %754 = vmatpush.msra.mxu1 %v629_v9  ;;  %v617_v37 = vld [vmem:[%s3883_s1 + $0x110] sm:$0xff]  ;;  %v655_v38 = vld [vmem:[%s3883_s1 + $0x240] sm:$0xff]  ;;  %v636_v57 = vld [vmem:[%s3883_s1 + $0x1a8] sm:$0xff] }
  0x34   : > { %835 = vmatpush.msrb.mxu3 %v610_v8  ;;  %728 = vmatpush.msra.mxu0 %v591_v10  ;;  %v653_v42 = vld [vmem:[%s3883_s1 + $0x230] sm:$0xff]  ;;  %v651_v45 = vld [vmem:[%s3883_s1 + $0x220] sm:$0xff]  ;;  %v672_v58 = vld [vmem:[%s3883_s1 + $0x2c8] sm:$0xff] }
  0x35   : > { %781 = vmatpush.msra.mxu2 %v665_v12  ;;  %755 = vmatpush.msra.mxu1 %v627_v15  ;;  %v649_v49 = vld [vmem:[%s3883_s1 + $0x210] sm:$0xff]  ;;  %v647_v53 = vld [vmem:[%s3883_s1 + $0x200] sm:$0xff]  ;;  %v634_v60 = vld [vmem:[%s3883_s1 + $0x198] sm:$0xff] }
  0x36   : > { %836 = vmatpush.msrb.mxu3 %v608_v11  ;;  %729 = vmatpush.msra.mxu0 %v589_v16  ;;  %v670_v61 = vld [vmem:[%s3883_s1 + $0x2b8] sm:$0xff]  ;;  %v632_v62 = vld [vmem:[%s3883_s1 + $0x188] sm:$0xff] }
  0x37   : > { %514 = vrot.lane.b32.xlu1 %v506_v41, %s3920_s17  ;;  %2118 = vmatmul.msk.f32.gmra.mxu3 %vm568_vm4, %v2672_v13  ;;  %v615_v41 = vld [vmem:[%s3883_s1 + $0x100] sm:$0xff]  ;;  %v668_v63 = vld [vmem:[%s3883_s1 + $0x2a8] sm:$0xff]  ;;  %v630_v0 = vld [vmem:[%s3883_s1 + $0x178] sm:$0xff]  ;;  %s2334_s17 = smov 84  }
  0x38   : > { %837 = vmatpush.msrb.mxu3 %v606_v14  ;;  %782 = vmatpush.msra.mxu2 %v663_v17  ;;  %v666_v1 = vld [vmem:[%s3883_s1 + $0x298] sm:$0xff]  ;;  %v628_v5 = vld [vmem:[%s3883_s1 + $0x168] sm:$0xff] }
  0x39   : > { %756 = vmatpush.msra.mxu1 %v625_v19  ;;  %730 = vmatpush.msra.mxu0 %v587_v21  ;;  %v664_v6 = vld [vmem:[%s3883_s1 + $0x288] sm:$0xff]  ;;  %v702_v7 = vld [vmem:[%s3883_s1 + $0x3b8] sm:$0xff] }
  0x3a   : > { %554 = vrot.lane.b32.xlu0 %v546_v48, %s3919_s0  ;;  %838 = vmatpush.msrb.mxu3 %v604_v18  ;;  %v678_v48 = vld [vmem:[%s3883_s1 + $0x2f8] sm:$0xff]  ;;  %v700_v10 = vld [vmem:[%s3883_s1 + $0x3a8] sm:$0xff] }
  0x3b   : > { %783 = vmatpush.msra.mxu2 %v661_v22  ;;  %757 = vmatpush.msra.mxu1 %v623_v25  ;;  %v626_v8 = vld [vmem:[%s3883_s1 + $0x158] sm:$0xff]  ;;  %v624_v11 = vld [vmem:[%s3883_s1 + $0x148] sm:$0xff] }
  0x3c   : > { %839 = vmatpush.msrb.mxu3 %v602_v23  ;;  %731 = vmatpush.msra.mxu0 %v585_v26  ;;  %v662_v9 = vld [vmem:[%s3883_s1 + $0x278] sm:$0xff]  ;;  %v660_v14 = vld [vmem:[%s3883_s1 + $0x268] sm:$0xff] }
  0x3d   : > { %784 = vmatpush.msra.mxu2 %v659_v27  ;;  %758 = vmatpush.msra.mxu1 %v621_v29  ;;  %v698_v12 = vld [vmem:[%s3883_s1 + $0x398] sm:$0xff]  ;;  %v696_v16 = vld [vmem:[%s3883_s1 + $0x388] sm:$0xff] }
  0x3e   : > { %840 = vmatpush.msrb.mxu3 %v600_v28  ;;  %732 = vmatpush.msra.mxu0 %v583_v33  ;;  %v622_v15 = vld [vmem:[%s3883_s1 + $0x138] sm:$0xff]  ;;  %v620_v18 = vld [vmem:[%s3883_s1 + $0x128] sm:$0xff] }
  0x3f   : > { %2119 = vmatmul.msk.f32.gmra.mxu3 %vm568_vm4, %v2724_v30  ;;  %759 = vmatpush.msra.mxu1 %v619_v34  ;;  %v658_v17 = vld [vmem:[%s3883_s1 + $0x258] sm:$0xff]  ;;  %v656_v19 = vld [vmem:[%s3883_s1 + $0x248] sm:$0xff] }
  0x40   : > { %841 = vmatpush.msrb.mxu3 %v598_v31  ;;  %785 = vmatpush.msra.mxu2 %v657_v35  ;;  %v694_v21 = vld [vmem:[%s3883_s1 + $0x378] sm:$0xff]  ;;  %v692_v23 = vld [vmem:[%s3883_s1 + $0x368] sm:$0xff] }
  0x41   : > { %760 = vmatpush.msra.mxu1 %v617_v37  ;;  %862 = vmatpush.msrb.mxu0 %v646_v40  ;;  %v618_v22 = vld [vmem:[%s3883_s1 + $0x118] sm:$0xff]  ;;  %v616_v27 = vld [vmem:[%s3883_s1 + $0x108] sm:$0xff] }
  0x42   : > { %842 = vmatpush.msrb.mxu3 %v596_v32  ;;  %786 = vmatpush.msra.mxu2 %v655_v38  ;;  %v654_v26 = vld [vmem:[%s3883_s1 + $0x238] sm:$0xff]  ;;  %v652_v31 = vld [vmem:[%s3883_s1 + $0x228] sm:$0xff] }
  0x43   : > { %761 = vmatpush.msra.mxu1 %v615_v41  ;;  %863 = vmatpush.msrb.mxu0 %v644_v44  ;;  %v690_v29 = vld [vmem:[%s3883_s1 + $0x358] sm:$0xff]  ;;  %v688_v33 = vld [vmem:[%s3883_s1 + $0x348] sm:$0xff] }
  0x44   : > { %843 = vmatpush.msrb.mxu3 %v594_v36  ;;  %787 = vmatpush.msra.mxu2 %v653_v42  ;;  %v650_v34 = vld [vmem:[%s3883_s1 + $0x218] sm:$0xff]  ;;  %v648_v40 = vld [vmem:[%s3883_s1 + $0x208] sm:$0xff] }
  0x45   : > { %864 = vmatpush.msrb.mxu0 %v642_v47  ;;  %891 = vmatpush.msrb.mxu1 %v678_v48  ;;  %v686_v35 = vld [vmem:[%s3883_s1 + $0x338] sm:$0xff]  ;;  %v684_v41 = vld [vmem:[%s3883_s1 + $0x328] sm:$0xff] }
  0x46   : > { %844 = vmatpush.msrb.mxu3 %v592_v39  ;;  %788 = vmatpush.msra.mxu2 %v651_v45  ;;  %v680_v45 = vld [vmem:[%s3883_s1 + $0x308] sm:$0xff] }
  0x47   : > { %2120 = vmatmul.msk.f32.gmra.mxu3 %vm568_vm4, %v2696_v20  ;;  %865 = vmatpush.msrb.mxu0 %v640_v51 }
  0x48   : > { %845 = vmatpush.msrb.mxu3 %v590_v43  ;;  %789 = vmatpush.msra.mxu2 %v649_v49 }
  0x49   : > { %892 = vmatpush.msrb.mxu1 %v676_v52  ;;  %866 = vmatpush.msrb.mxu0 %v638_v55 }
  0x4a   : > { %846 = vmatpush.msrb.mxu3 %v588_v46  ;;  %790 = vmatpush.msra.mxu2 %v647_v53 }
  0x4b   : > { %893 = vmatpush.msrb.mxu1 %v674_v56  ;;  %867 = vmatpush.msrb.mxu0 %v636_v57 }
  0x4c   : > { %847 = vmatpush.msrb.mxu3 %v586_v50  ;;  %924 = vmatpush.msrb.mxu2 %v702_v7 }
  0x4d   : > { %894 = vmatpush.msrb.mxu1 %v672_v58  ;;  %868 = vmatpush.msrb.mxu0 %v634_v60 }
  0x4e   : > { %848 = vmatpush.msrb.mxu3 %v584_v54  ;;  %925 = vmatpush.msrb.mxu2 %v700_v10 }
  0x4f   : > { %895 = vmatpush.msrb.mxu1 %v670_v61  ;;  %869 = vmatpush.msrb.mxu0 %v632_v62 }
  0x50   : > { %926 = vmatpush.msrb.mxu2 %v698_v12 }
  0x51   : > { %896 = vmatpush.msrb.mxu1 %v668_v63  ;;  %870 = vmatpush.msrb.mxu0 %v630_v0 }
  0x52   : > { %927 = vmatpush.msrb.mxu2 %v696_v16 }
  0x53   : > { %897 = vmatpush.msrb.mxu1 %v666_v1  ;;  %871 = vmatpush.msrb.mxu0 %v628_v5 }
  0x54   : > { %928 = vmatpush.msrb.mxu2 %v694_v21 }
  0x55   : > { %898 = vmatpush.msrb.mxu1 %v664_v6  ;;  %872 = vmatpush.msrb.mxu0 %v626_v8 }
  0x56   : > { %929 = vmatpush.msrb.mxu2 %v692_v23 }
  0x57   : > { %899 = vmatpush.msrb.mxu1 %v662_v9  ;;  %873 = vmatpush.msrb.mxu0 %v624_v11 }
  0x58   : > { %930 = vmatpush.msrb.mxu2 %v690_v29 }
  0x59   : > { %900 = vmatpush.msrb.mxu1 %v660_v14  ;;  %874 = vmatpush.msrb.mxu0 %v622_v15 }
  0x5a   : > { %931 = vmatpush.msrb.mxu2 %v688_v33 }
  0x5b   : > { %901 = vmatpush.msrb.mxu1 %v658_v17  ;;  %875 = vmatpush.msrb.mxu0 %v620_v18 }
  0x5c   : > { %932 = vmatpush.msrb.mxu2 %v686_v35 }
  0x5d   : > { %902 = vmatpush.msrb.mxu1 %v656_v19  ;;  %876 = vmatpush.msrb.mxu0 %v618_v22 }
  0x5e   : > { %933 = vmatpush.msrb.mxu2 %v684_v41 }
  0x5f   : > { %903 = vmatpush.msrb.mxu1 %v654_v26  ;;  %877 = vmatpush.msrb.mxu0 %v616_v27 }
  0x61   : > { %904 = vmatpush.msrb.mxu1 %v652_v31 }
  0x63   : > { %905 = vmatpush.msrb.mxu1 %v650_v34 }
  0x65   : > { %906 = vmatpush.msrb.mxu1 %v648_v40 }
  0x7a   : > { %v511_v36 = vpop.permute.xlu2 %510 }
  0x7b   : > { %v570_v38 = vsel %vm568_vm4, %v2482_v3, %v511_v36  ;;  %v682_v3 = vld [vmem:[%s3883_s1 + $0x318] sm:$0xff] }
  0x7c   : > { %934 = vmatpush.msrb.mxu2 %v682_v3 }
  0x7e   : > { %935 = vmatpush.msrb.mxu2 %v680_v45 }
  0x82   : > { %v533_v47 = vpop.permute.xlu2 %532 }
  0x8a   : > { %v535_v55 = vpop.permute.xlu2 %534 }
  0x91   : > { %v509_v25 = vpop.permute.xlu1 %508 }
  0x92   : > { %v569_v28 = vsel %vm568_vm4, %v2479_v2, %v509_v25 }
  0x93   : > { %733 = vmatmul.f32.vlgmr.msra.gmra.mxu0 %v569_v28  ;;  %849 = vmatmul.f32.vlgmr.msrb.gmra.mxu3 %v569_v28 }
  0x94   : > { %v2257_v32 = vpop.permute.xlu0 %2256 }
  0x95   : > { %v2258_v2 = vunpack.i.l.bf16 %v2257_v32  ;;  %v2259_v42 = vunpack.i.h.bf16 %v2257_v32 }
  0x97   : > { %v574_v37 = vsel %vm573_vm5, %v509_v25, %v2258_v2  ;;  %v575_v46 = vsel %vm573_vm5, %v511_v36, %v2259_v42 }
  0x98   : > { %762 = vmatmul.f32.vlgmr.msra.gmra.mxu1 %v574_v37 }
  0x99   : > { %v551_v39 = vpop.permute.xlu1 %550 }
  0x9a   : > { %v580_v50 = vsel %vm578_vm6, %v2259_v42, %v551_v39  ;;  %v957_v42 = vld [vmem:[%s3885_s3] sm:$0xff] }
  0x9b   : > { %736 = vmatmul.f32.gmra.mxu0 %v570_v38  ;;  %852 = vmatmul.f32.gmra.mxu3 %v570_v38 }
  0x9c   : > { %v549_v43 = vpop.permute.xlu0 %548 }
  0x9d   : > { %v579_v44 = vsel %vm578_vm6, %v2258_v2, %v549_v43 }
  0x9e   : > { %791 = vmatmul.f32.vlgmr.msra.gmra.mxu2 %v579_v44 }
  0xa0   : > { %765 = vmatmul.f32.gmra.mxu1 %v575_v46 }
  0xa1   : > { %v513_v48 = vpop.permute.xlu1 %512 }
  0xa2   : > { %v571_v49 = vsel %vm568_vm4, %v2485_v4, %v513_v48  ;;  %v576_v51 = vsel %vm573_vm5, %v513_v48, %v533_v47 }
  0xa3   : > { %739 = vmatmul.f32.gmra.mxu0 %v571_v49  ;;  %855 = vmatmul.f32.gmra.mxu3 %v571_v49 }
  0xa4   : > { %v553_v52 = vpop.permute.xlu0 %552 }
  0xa5   : > { %v581_v56 = vsel %vm578_vm6, %v533_v47, %v553_v52  ;;  %v2957_v47 = vld [vmem:[%s3885_s3 + $0x8] sm:$0x3f] }
  0xa6   : > { %794 = vmatmul.f32.gmra.mxu2 %v580_v50 }
  0xa8   : > { %768 = vmatmul.f32.gmra.mxu1 %v576_v51 }
  0xa9   : > { %v515_v53 = vpop.permute.xlu1 %514 }
  0xaa   : > { %v572_v54 = vsel %vm568_vm4, %v2521_v24, %v515_v53  ;;  %v577_v4 = vsel %vm573_vm5, %v515_v53, %v535_v55 }
  0xab   : > { %742 = vmatmul.f32.gmra.mxu0 %v572_v54  ;;  %858 = vmatmul.f32.gmra.mxu3 %v572_v54 }
  0xac   : > { %v555_v57 = vpop.permute.xlu0 %554 }
  0xad   : > { %v582_v58 = vsel %vm578_vm6, %v535_v55, %v555_v57  ;;  %v2132_v55 = vld [vmem:[%s3885_s3 + $0x18] sm:$0x3f] }
  0xae   : > { %797 = vmatmul.f32.gmra.mxu2 %v581_v56 }
  0xb0   : > { %771 = vmatmul.f32.gmra.mxu1 %v577_v4 }
  0xb2   : > { %v821_v24 = vpop.f32.mrf.mxu3 }
  0xb3   : > { %878 = vmatmul.f32.vlgmr.msrb.gmra.mxu0 %v574_v37 }
  0xb6   : > { %800 = vmatmul.f32.gmra.mxu2 %v582_v58 }
  0xb8   : > { %907 = vmatmul.f32.vlgmr.msrb.gmra.mxu1 %v579_v44 }
  0xba   : > { %v824_v62 = vpop.f32.mrf.mxu3 }
  0xbb   : > { %881 = vmatmul.f32.gmra.mxu0 %v575_v46  ;;  %v2952_v46 = vld [vmem:[%s3885_s3 + $0x10] sm:$0xff] }
  0xbe   : > { %2121 = vmatmul.msk.f32.vlgmr.msrb.gmra.mxu2 %vm568_vm4, %v2620_v59 }
  0xc0   : > { %910 = vmatmul.f32.gmra.mxu1 %v580_v50 }
  0xc2   : > { %v827_v0 = vpop.f32.mrf.mxu3 }
  0xc3   : > { %884 = vmatmul.f32.gmra.mxu0 %v576_v51 }
  0xc6   : > { %2122 = vmatmul.msk.f32.gmra.mxu2 %vm568_vm4, %v2672_v13 }
  0xc8   : > { %913 = vmatmul.f32.gmra.mxu1 %v581_v56 }
  0xca   : > { %v830_v7 = vpop.f32.mrf.mxu3 }
  0xcb   : > { %887 = vmatmul.f32.gmra.mxu0 %v577_v4 }
  0xce   : > { %2123 = vmatmul.msk.f32.gmra.mxu2 %vm568_vm4, %v2724_v30  ;;  %v703_v30 = vld [vmem:[%s3884_s2] sm:$0x3] }
  0xcf   : > { %v705_v10 = vperm.slane %v703_v30, 0  ;;  %v706_v50 = vperm.slane %v703_v30, 1 }
  0xd0   : > { %916 = vmatmul.f32.gmra.mxu1 %v582_v58 }
  0xd6   : > { %2124 = vmatmul.msk.f32.gmra.mxu2 %vm568_vm4, %v2696_v20 }
 0x110   : > { %v734_v60 = vpop.f32.mrf.mxu0 }
 0x111   : > { %v735_v17 = vadd.f32 %v734_v60, %v705_v10 }
 0x115   : > { %v763_v61 = vpop.f32.mrf.mxu1 }
 0x116   : > { %v850_v15 = vpop.f32.mrf.mxu3  ;;  %v764_v26 = vadd.f32 %v763_v61, %v735_v17  ;;  %v1088_v17 = vld [vmem:[%s3886_s4 + $0x58] sm:$0xff] }
 0x117   : > { %v851_v58 = vadd.f32 %v850_v15, %v706_v50 }
 0x118   : > { %v737_v63 = vpop.f32.mrf.mxu0 }
 0x119   : > { %v738_v12 = vadd.f32 %v737_v63, %v705_v10 }
 0x11d   : > { %v766_v59 = vpop.f32.mrf.mxu1 }
 0x11e   : > { %v767_v21 = vadd.f32 %v766_v59, %v738_v12  ;;  %v853_v34 = vpop.f32.mrf.mxu3  ;;  %v2155_v12 = vld [vmem:[%s3886_s4 + $0x118] sm:$0xff] }
 0x11f   : > { %v854_v56 = vadd.f32 %v853_v34, %v706_v50  ;;  %v2147_v34 = vld [vmem:[%s3886_s4 + $0xd8] sm:$0xff] }
 0x120   : > { %v740_v1 = vpop.f32.mrf.mxu0 }
 0x121   : > { %v792_v5 = vpop.f32.mrf.mxu2  ;;  %v741_v11 = vadd.f32 %v740_v1, %v705_v10 }
 0x122   : > { %v793_v29 = vadd.f32 %v792_v5, %v764_v26  ;;  %v2151_v26 = vld [vmem:[%s3886_s4 + $0xf8] sm:$0xff] }
 0x124   : > { %v822_v36 = vadd.f32 %v821_v24, %v793_v29  ;;  %v2150_v29 = vld [vmem:[%s3886_s4 + $0xf0] sm:$0xff] }
 0x125   : > { %v769_v6 = vpop.f32.mrf.mxu1 }
 0x126   : > { %v770_v18 = vadd.f32 %v769_v6, %v741_v11  ;;  %v949_v41 = vmax.f32 %v822_v36, 0.0  ;;  %v856_v43 = vpop.f32.mrf.mxu3 }
 0x127   : > { %v857_v52 = vadd.f32 %v856_v43, %v706_v50 }
 0x128   : > { %v743_v8 = vpop.f32.mrf.mxu0 }
 0x129   : > { %v795_v13 = vpop.f32.mrf.mxu2  ;;  %v744_v14 = vadd.f32 %v743_v8, %v705_v10  ;;  %v1091_v8 = vld [vmem:[%s3886_s4 + $0x70] sm:$0xff]  ;;  %v1090_v10 = vld [vmem:[%s3886_s4 + $0x68] sm:$0xff] }
 0x12a   : > { %v796_v27 = vadd.f32 %v795_v13, %v767_v21  ;;  %v1085_v21 = vld [vmem:[%s3886_s4 + $0x40] sm:$0xff] }
 0x12c   : > { %v825_v33 = vadd.f32 %v824_v62, %v796_v27  ;;  %v1083_v27 = vld [vmem:[%s3886_s4 + $0x30] sm:$0xff] }
 0x12d   : > { %v772_v9 = vpop.f32.mrf.mxu1 }
 0x12e   : > { %v773_v22 = vadd.f32 %v772_v9, %v744_v14  ;;  %v951_v40 = vmax.f32 %v825_v33, 0.0  ;;  %v859_v48 = vpop.f32.mrf.mxu3  ;;  %v1089_v14 = vld [vmem:[%s3886_s4 + $0x60] sm:$0xff]  ;;  %v1080_v33 = vld [vmem:[%s3886_s4 + $0x18] sm:$0xff] }
 0x12f   : > { %v860_v53 = vadd.f32 %v859_v48, %v706_v50  ;;  %v2144_v48 = vld [vmem:[%s3886_s4 + $0xc0] sm:$0xff]  ;;  %v2158_v50 = vld [vmem:[%s3886_s4 + $0x130] sm:$0xff] }
 0x130   : > { %v879_v16 = vpop.f32.mrf.mxu0 }
 0x131   : > { %v798_v20 = vpop.f32.mrf.mxu2  ;;  %v880_v63 = vadd.f32 %v879_v16, %v851_v58  ;;  %v2154_v16 = vld [vmem:[%s3886_s4 + $0x110] sm:$0xff] }
 0x132   : > { %v799_v23 = vadd.f32 %v798_v20, %v770_v18  ;;  %v2156_v20 = vld [vmem:[%s3886_s4 + $0x120] sm:$0xff]  ;;  %v1087_v18 = vld [vmem:[%s3886_s4 + $0x50] sm:$0xff] }
 0x134   : > { %v828_v31 = vadd.f32 %v827_v0, %v799_v23  ;;  %v2153_v23 = vld [vmem:[%s3886_s4 + $0x108] sm:$0xff] }
 0x135   : > { %v908_v19 = vpop.f32.mrf.mxu1 }
 0x136   : > { %v953_v37 = vmax.f32 %v828_v31, 0.0  ;;  %v909_v5 = vadd.f32 %v908_v19, %v880_v63  ;;  %v1086_v19 = vld [vmem:[%s3886_s4 + $0x48] sm:$0xff]  ;;  %v1081_v31 = vld [vmem:[%s3886_s4 + $0x20] sm:$0xff] }
 0x138   : > { %v882_v35 = vpop.f32.mrf.mxu0 }
 0x139   : > { %v801_v25 = vpop.f32.mrf.mxu2  ;;  %v883_v24 = vadd.f32 %v882_v35, %v854_v56  ;;  %v1079_v35 = vld [vmem:[%s3886_s4 + $0x10] sm:$0xff] }
 0x13a   : > { %v802_v28 = vadd.f32 %v801_v25, %v773_v22  ;;  %v1084_v22 = vld [vmem:[%s3886_s4 + $0x38] sm:$0xff]  ;;  %v2152_v25 = vld [vmem:[%s3886_s4 + $0x100] sm:$0xff] }
 0x13c   : > { %v831_v32 = vadd.f32 %v830_v7, %v802_v28  ;;  %v1092_v7 = vld [vmem:[%s3886_s4 + $0x78] sm:$0xff]  ;;  %v1082_v28 = vld [vmem:[%s3886_s4 + $0x28] sm:$0xff] }
 0x13d   : > { %v911_v38 = vpop.f32.mrf.mxu1 }
 0x13e   : > { %v955_v2 = vmax.f32 %v831_v32, 0.0  ;;  %v912_v59 = vadd.f32 %v911_v38, %v883_v24  ;;  %v2149_v32 = vld [vmem:[%s3886_s4 + $0xe8] sm:$0xff] }
 0x13f   : > { %v1078_v38 = vld [vmem:[%s3886_s4 + $0x8] sm:$0xff] }
 0x140   : > { %2125 = vmatpush.msk.msra.mxu3 %vm560_vm3, %v955_v2  ;;  %2133 = vmatpush.msk.msra.mxu1 %vm560_vm3, %v955_v2  ;;  %v885_v3 = vpop.f32.mrf.mxu0  ;;  %v2148_v2 = vld [vmem:[%s3886_s4 + $0xe0] sm:$0xff] }
 0x141   : > { %v937_v39 = vpop.f32.mrf.mxu2  ;;  %v886_v4 = vadd.f32 %v885_v3, %v857_v52  ;;  %v2160_v3 = vld [vmem:[%s3886_s4 + $0x140] sm:$0xff] }
 0x142   : > { %985 = vmatpush.msra.mxu3 %v953_v37  ;;  %1040 = vmatpush.msra.mxu1 %v953_v37  ;;  %v938_v30 = vadd.f32 %v937_v39, %v909_v5  ;;  %v1097_v39 = vld [vmem:[%s3886_s4 + $0xa0] sm:$0xff] }
 0x143   : > { %1139 = vmatpush.msra.mxu0 %v1097_v39 }
 0x144   : > { %986 = vmatpush.msra.mxu3 %v951_v40  ;;  %1041 = vmatpush.msra.mxu1 %v951_v40  ;;  %v950_v15 = vmax.f32 %v938_v30, 0.0  ;;  %v2161_v40 = vld [vmem:[%s3886_s4 + $0x148] sm:$0xff] }
 0x145   : > { %v914_v45 = vpop.f32.mrf.mxu1 }
 0x146   : > { %987 = vmatpush.msra.mxu3 %v949_v41  ;;  %1042 = vmatpush.msra.mxu1 %v949_v41  ;;  %v915_v60 = vadd.f32 %v914_v45, %v886_v4  ;;  %v1077_v41 = vld [vmem:[%s3886_s4] sm:$0xff]  ;;  %v2146_v45 = vld [vmem:[%s3886_s4 + $0xd0] sm:$0xff] }
 0x147   : > { %2126 = vmatmul.msk.f32.vlgmr.msra.gmra.mxu3 %vm959_vm7, %v957_v42  ;;  %2134 = vmatmul.msk.f32.vlgmr.msra.gmra.mxu1 %vm959_vm7, %v2952_v46  ;;  %v2142_v4 = vld [vmem:[%s3886_s4 + $0xb0] sm:$0xff] }
 0x148   : > { %v888_v51 = vpop.f32.mrf.mxu0  ;;  %1105 = vmatpush.msrb.mxu3 %v1092_v7  ;;  %1173 = vmatpush.msrb.mxu1 %v2156_v20  ;;  %v1294_v20 = vld [vmem:[%s3887_s5 + $0xc0] sm:$0xff] }
 0x149   : > { %v940_v44 = vpop.f32.mrf.mxu2  ;;  %v889_v57 = vadd.f32 %v888_v51, %v860_v53  ;;  %v1093_v53 = vld [vmem:[%s3886_s4 + $0x80] sm:$0xff] }
 0x14a   : > { %v941_v6 = vadd.f32 %v940_v44, %v912_v59  ;;  %1106 = vmatpush.msrb.mxu3 %v1091_v8  ;;  %1174 = vmatpush.msrb.mxu1 %v2155_v12  ;;  %v1095_v44 = vld [vmem:[%s3886_s4 + $0x90] sm:$0xff]  ;;  %v1330_v12 = vld [vmem:[%s3887_s5 + $0x1e0] sm:$0xff] }
 0x14b   : > { %v1296_v8 = vld [vmem:[%s3887_s5 + $0xd0] sm:$0xff] }
 0x14c   : > { %v952_v11 = vmax.f32 %v941_v6, 0.0  ;;  %1107 = vmatpush.msrb.mxu3 %v1090_v10  ;;  %1175 = vmatpush.msrb.mxu1 %v2154_v16  ;;  %v1300_v6 = vld [vmem:[%s3887_s5 + $0xf0] sm:$0xff] }
 0x14d   : > { %v917_v54 = vpop.f32.mrf.mxu1 }
 0x14e   : > { %v918_v61 = vadd.f32 %v917_v54, %v889_v57  ;;  %1108 = vmatpush.msrb.mxu3 %v1089_v14  ;;  %1176 = vmatpush.msrb.mxu1 %v2153_v23  ;;  %v2157_v54 = vld [vmem:[%s3886_s4 + $0x128] sm:$0xff]  ;;  %v1372_v23 = vld [vmem:[%s3887_s5 + $0x330] sm:$0xff] }
 0x14f   : > { %2127 = vmatmul.msk.f32.gmra.mxu3 %vm959_vm7, %v2957_v47  ;;  %2135 = vmatmul.msk.f32.gmra.mxu1 %vm959_vm7, %v2132_v55  ;;  %v2141_v57 = vld [vmem:[%s3886_s4 + $0xa8] sm:$0xff] }
 0x150   : > { %1109 = vmatpush.msrb.mxu3 %v1088_v17  ;;  %1177 = vmatpush.msrb.mxu1 %v2152_v25  ;;  %v1292_v17 = vld [vmem:[%s3887_s5 + $0xb0] sm:$0xff]  ;;  %v1290_v25 = vld [vmem:[%s3887_s5 + $0xa0] sm:$0xff] }
 0x151   : > { %v943_v49 = vpop.f32.mrf.mxu2 }
 0x152   : > { %v944_v0 = vadd.f32 %v943_v49, %v915_v60  ;;  %1110 = vmatpush.msrb.mxu3 %v1087_v18  ;;  %1178 = vmatpush.msrb.mxu1 %v2151_v26  ;;  %v1094_v49 = vld [vmem:[%s3886_s4 + $0x88] sm:$0xff]  ;;  %v1328_v18 = vld [vmem:[%s3887_s5 + $0x1d0] sm:$0xff]  ;;  %v1326_v26 = vld [vmem:[%s3887_s5 + $0x1c0] sm:$0xff] }
 0x154   : > { %v954_v9 = vmax.f32 %v944_v0, 0.0  ;;  %1111 = vmatpush.msrb.mxu3 %v1086_v19  ;;  %1179 = vmatpush.msrb.mxu1 %v2150_v29  ;;  %v1374_v19 = vld [vmem:[%s3887_s5 + $0x340] sm:$0xf] }
 0x156   : > { %1112 = vmatpush.msrb.mxu3 %v1085_v21  ;;  %1180 = vmatpush.msrb.mxu1 %v2149_v32  ;;  %v1288_v32 = vld [vmem:[%s3887_s5 + $0x90] sm:$0xff] }
 0x158   : > { %1113 = vmatpush.msrb.mxu3 %v1084_v22  ;;  %1181 = vmatpush.msrb.mxu1 %v2148_v2 }
 0x159   : > { %v946_v62 = vpop.f32.mrf.mxu2 }
 0x15a   : > { %v947_v1 = vadd.f32 %v946_v62, %v918_v61  ;;  %1114 = vmatpush.msrb.mxu3 %v1083_v27  ;;  %1182 = vmatpush.msrb.mxu1 %v2147_v34 }
 0x15c   : > { %v956_v13 = vmax.f32 %v947_v1, 0.0  ;;  %1115 = vmatpush.msrb.mxu3 %v1082_v28  ;;  %1183 = vmatpush.msrb.mxu1 %v2146_v45  ;;  %v1370_v28 = vld [vmem:[%s3887_s5 + $0x320] sm:$0xff] }
 0x15d   : > { %v1366_v45 = vld [vmem:[%s3887_s5 + $0x300] sm:$0xff] }
 0x15e   : > { %2128 = vmatpush.msk.msra.mxu2 %vm560_vm3, %v956_v13  ;;  %1116 = vmatpush.msrb.mxu3 %v1081_v31 }
 0x160   : > { %1008 = vmatpush.msra.mxu2 %v954_v9  ;;  %1117 = vmatpush.msrb.mxu3 %v1080_v33  ;;  %v1364_v33 = vld [vmem:[%s3887_s5 + $0x2f0] sm:$0xff] }
 0x162   : > { %1009 = vmatpush.msra.mxu2 %v952_v11  ;;  %1118 = vmatpush.msrb.mxu3 %v1079_v35 }
 0x164   : > { %1010 = vmatpush.msra.mxu2 %v950_v15  ;;  %1119 = vmatpush.msrb.mxu3 %v1078_v38  ;;  %v1324_v38 = vld [vmem:[%s3887_s5 + $0x1b0] sm:$0xff] }
 0x165   : > { %2129 = vmatmul.msk.f32.vlgmr.msra.gmra.mxu2 %vm959_vm7, %v957_v42  ;;  %v1096_v42 = vld [vmem:[%s3886_s4 + $0x98] sm:$0xff] }
 0x166   : > { %2136 = vmatpush.msk.msrb.mxu2 %vm560_vm3, %v956_v13  ;;  %1140 = vmatpush.msra.mxu0 %v1096_v42  ;;  %v1298_v13 = vld [vmem:[%s3887_s5 + $0xe0] sm:$0xff]  ;;  %v1368_v42 = vld [vmem:[%s3887_s5 + $0x310] sm:$0xff] }
 0x167   : > { %1120 = vmatpush.msrb.mxu3 %v1077_v41 }
 0x168   : > { %1063 = vmatpush.msrb.mxu2 %v954_v9  ;;  %1141 = vmatpush.msra.mxu0 %v1095_v44  ;;  %v1322_v44 = vld [vmem:[%s3887_s5 + $0x1a0] sm:$0xff] }
 0x169   : > { %1439 = vmatpush.msra.mxu3 %v1364_v33  ;;  %v1317_v33 = vld [vmem:[%s3887_s5 + $0x178] sm:$0xff] }
 0x16a   : > { %1064 = vmatpush.msrb.mxu2 %v952_v11  ;;  %1142 = vmatpush.msra.mxu0 %v1094_v49  ;;  %v1332_v11 = vld [vmem:[%s3887_s5 + $0x1f0] sm:$0xff]  ;;  %v1333_v49 = vld [vmem:[%s3887_s5 + $0x1f8] sm:$0xff] }
 0x16c   : > { %1065 = vmatpush.msrb.mxu2 %v950_v15  ;;  %1143 = vmatpush.msra.mxu0 %v1093_v53 }
 0x16d   : > { %2130 = vmatmul.msk.f32.gmra.mxu2 %vm959_vm7, %v2957_v47  ;;  %v2145_v47 = vld [vmem:[%s3886_s4 + $0xc8] sm:$0xff] }
 0x16e   : > { %1207 = vmatpush.msra.mxu2 %v2161_v40  ;;  %1184 = vmatpush.msrb.mxu1 %v2145_v47  ;;  %v1282_v47 = vld [vmem:[%s3887_s5 + $0x60] sm:$0xff] }
 0x16f   : > { %1393 = vmatpush.msrb.mxu0 %v1300_v6  ;;  %v1299_v6 = vld [vmem:[%s3887_s5 + $0xe8] sm:$0xff] }
 0x170   : > { %1208 = vmatpush.msra.mxu2 %v2160_v3  ;;  %1185 = vmatpush.msrb.mxu1 %v2144_v48  ;;  %v1284_v3 = vld [vmem:[%s3887_s5 + $0x70] sm:$0xff] }
 0x171   : > { %1394 = vmatpush.msrb.mxu0 %v1298_v13  ;;  %v1320_v48 = vld [vmem:[%s3887_s5 + $0x190] sm:$0xff]  ;;  %v1297_v13 = vld [vmem:[%s3887_s5 + $0xd8] sm:$0xff] }
 0x173   : > { %1395 = vmatpush.msrb.mxu0 %v1296_v8  ;;  %v1293_v8 = vld [vmem:[%s3887_s5 + $0xb8] sm:$0xff] }
 0x175   : > { %2137 = vmatmul.msk.f32.vlgmr.msrb.gmra.mxu2 %vm959_vm7, %v2952_v46  ;;  %v2159_v46 = vld [vmem:[%s3886_s4 + $0x138] sm:$0xff]  ;;  %1396 = vmatpush.msrb.mxu0 %v1294_v20 }
 0x176   : > { %1209 = vmatpush.msra.mxu2 %v2159_v46  ;;  %v1362_v46 = vld [vmem:[%s3887_s5 + $0x2e0] sm:$0xff]  ;;  %v1289_v20 = vld [vmem:[%s3887_s5 + $0x98] sm:$0xff] }
 0x177   : > { %1397 = vmatpush.msrb.mxu0 %v1292_v17  ;;  %1440 = vmatpush.msra.mxu3 %v1362_v46  ;;  %v1323_v17 = vld [vmem:[%s3887_s5 + $0x1a8] sm:$0xff]  ;;  %v1273_v46 = vld [vmem:[%s3887_s5 + $0x18] sm:$0xff] }
 0x178   : > { %1210 = vmatpush.msra.mxu2 %v2158_v50  ;;  %v1360_v50 = vld [vmem:[%s3887_s5 + $0x2d0] sm:$0xff] }
 0x179   : > { %1398 = vmatpush.msrb.mxu0 %v1290_v25  ;;  %1441 = vmatpush.msra.mxu3 %v1360_v50  ;;  %v1350_v25 = vld [vmem:[%s3887_s5 + $0x280] sm:$0xff]  ;;  %v1271_v50 = vld [vmem:[%s3887_s5 + $0x8] sm:$0xff] }
 0x17a   : > { %1211 = vmatpush.msra.mxu2 %v2157_v54  ;;  %v1278_v54 = vld [vmem:[%s3887_s5 + $0x40] sm:$0xff] }
 0x17b   : > { %1399 = vmatpush.msrb.mxu0 %v1288_v32  ;;  %v1281_v32 = vld [vmem:[%s3887_s5 + $0x58] sm:$0xff] }
 0x17c   : > { %1416 = vmatpush.msrb.mxu2 %v1332_v11  ;;  %v1325_v11 = vld [vmem:[%s3887_s5 + $0x1b8] sm:$0xff] }
 0x17d   : > { %2138 = vmatmul.msk.f32.gmra.mxu2 %vm959_vm7, %v2132_v55  ;;  %v2143_v55 = vld [vmem:[%s3886_s4 + $0xb8] sm:$0xff] }
 0x17e   : > { %1186 = vmatpush.msrb.mxu1 %v2143_v55  ;;  %1417 = vmatpush.msrb.mxu2 %v1330_v12  ;;  %v1316_v55 = vld [vmem:[%s3887_s5 + $0x170] sm:$0xff] }
 0x17f   : > { %v1308_v12 = vld [vmem:[%s3887_s5 + $0x130] sm:$0xff] }
 0x180   : > { %1187 = vmatpush.msrb.mxu1 %v2142_v4  ;;  %1418 = vmatpush.msrb.mxu2 %v1328_v18  ;;  %v1331_v4 = vld [vmem:[%s3887_s5 + $0x1e8] sm:$0xff]  ;;  %v1306_v18 = vld [vmem:[%s3887_s5 + $0x120] sm:$0xff] }
 0x182   : > { %1188 = vmatpush.msrb.mxu1 %v2141_v57  ;;  %1419 = vmatpush.msrb.mxu2 %v1326_v26  ;;  %v1276_v57 = vld [vmem:[%s3887_s5 + $0x30] sm:$0xff]  ;;  %v1283_v26 = vld [vmem:[%s3887_s5 + $0x68] sm:$0xff] }
 0x184   : > { %2164 = vmatpush.msk.msra.mxu1 %vm560_vm3, %v1374_v19  ;;  %1420 = vmatpush.msrb.mxu2 %v1324_v38  ;;  %v1352_v19 = vld [vmem:[%s3887_s5 + $0x290] sm:$0xff] }
 0x185   : > { %v1344_v38 = vld [vmem:[%s3887_s5 + $0x250] sm:$0xff] }
 0x186   : > { %1474 = vmatpush.msra.mxu1 %v1372_v23  ;;  %1421 = vmatpush.msrb.mxu2 %v1322_v44  ;;  %v1304_v23 = vld [vmem:[%s3887_s5 + $0x110] sm:$0xff]  ;;  %v1359_v44 = vld [vmem:[%s3887_s5 + $0x2c8] sm:$0xff] }
 0x188   : > { %1475 = vmatpush.msra.mxu1 %v1370_v28  ;;  %1422 = vmatpush.msrb.mxu2 %v1320_v48  ;;  %v1319_v28 = vld [vmem:[%s3887_s5 + $0x188] sm:$0xff]  ;;  %v1357_v48 = vld [vmem:[%s3887_s5 + $0x2b8] sm:$0xff] }
 0x18a   : > { %1476 = vmatpush.msra.mxu1 %v1368_v42  ;;  %v1342_v42 = vld [vmem:[%s3887_s5 + $0x240] sm:$0xff] }
 0x18c   : > { %1477 = vmatpush.msra.mxu1 %v1366_v45  ;;  %v1340_v45 = vld [vmem:[%s3887_s5 + $0x230] sm:$0xff] }
 0x1c4   : > { %v1044_v37 = vpop.f32.mrf.mxu1 }
 0x1ca   : > { %v989_v36 = vpop.f32.mrf.mxu3 }
 0x1cb   : > { %v1073_v43 = vmax.f32 %v989_v36, %v1044_v37  ;;  %v1286_v37 = vld [vmem:[%s3887_s5 + $0x80] sm:$0xff] }
 0x1cc   : > { %v1047_v52 = vpop.f32.mrf.mxu1  ;;  %1400 = vmatpush.msrb.mxu0 %v1286_v37  ;;  %v1363_v37 = vld [vmem:[%s3887_s5 + $0x2e8] sm:$0xff] }
 0x1cd   : > { %1121 = vmatmul.f32.vlgmr.msrb.gmra.mxu3 %v1073_v43  ;;  %1189 = vmatmul.f32.vlgmr.msrb.gmra.mxu1 %v1073_v43 }
 0x1ce   : > { %1401 = vmatpush.msrb.mxu0 %v1284_v3  ;;  %1508 = vmatpush.msrb.mxu1 %v1333_v49  ;;  %v1311_v3 = vld [vmem:[%s3887_s5 + $0x148] sm:$0xff]  ;;  %v1338_v49 = vld [vmem:[%s3887_s5 + $0x220] sm:$0xff] }
 0x1d0   : > { %1402 = vmatpush.msrb.mxu0 %v1282_v47  ;;  %1509 = vmatpush.msrb.mxu1 %v1331_v4  ;;  %v1309_v47 = vld [vmem:[%s3887_s5 + $0x138] sm:$0xff]  ;;  %v1303_v4 = vld [vmem:[%s3887_s5 + $0x108] sm:$0xff] }
 0x1d2   : > { %v992_v51 = vpop.f32.mrf.mxu3 }
 0x1d3   : > { %v1075_v56 = vmax.f32 %v992_v51, %v1047_v52  ;;  %v1280_v51 = vld [vmem:[%s3887_s5 + $0x50] sm:$0xff]  ;;  %v1318_v52 = vld [vmem:[%s3887_s5 + $0x180] sm:$0xff] }
 0x1d4   : > { %1403 = vmatpush.msrb.mxu0 %v1280_v51  ;;  %1423 = vmatpush.msrb.mxu2 %v1318_v52  ;;  %v1307_v51 = vld [vmem:[%s3887_s5 + $0x128] sm:$0xff] }
 0x1d5   : > { %1124 = vmatmul.f32.gmra.mxu3 %v1075_v56  ;;  %1192 = vmatmul.f32.gmra.mxu1 %v1075_v56  ;;  %v1355_v52 = vld [vmem:[%s3887_s5 + $0x2a8] sm:$0xff] }
 0x1d6   : > { %1404 = vmatpush.msrb.mxu0 %v1278_v54  ;;  %1424 = vmatpush.msrb.mxu2 %v1316_v55  ;;  %v1305_v54 = vld [vmem:[%s3887_s5 + $0x118] sm:$0xff] }
 0x1d7   : > { %v1353_v55 = vld [vmem:[%s3887_s5 + $0x298] sm:$0xff] }
 0x1d8   : > { %1405 = vmatpush.msrb.mxu0 %v1276_v57  ;;  %v1351_v57 = vld [vmem:[%s3887_s5 + $0x288] sm:$0xff] }
 0x1e8   : > { %v1012_v58 = vpop.f32.mrf.mxu2 }
 0x1f0   : > { %v1015_v24 = vpop.f32.mrf.mxu2 }
 0x1f8   : > { %v1067_v60 = vpop.f32.mrf.mxu2 }
 0x1f9   : > { %v1074_v61 = vmax.f32 %v1012_v58, %v1067_v60  ;;  %v1314_v58 = vld [vmem:[%s3887_s5 + $0x160] sm:$0xff]  ;;  %v1329_v60 = vld [vmem:[%s3887_s5 + $0x1d8] sm:$0xff] }
 0x1fa   : > { %1425 = vmatpush.msrb.mxu2 %v1314_v58  ;;  %1510 = vmatpush.msrb.mxu1 %v1329_v60  ;;  %v1349_v58 = vld [vmem:[%s3887_s5 + $0x278] sm:$0xff] }
 0x1fb   : > { %2139 = vmatmul.msk.f32.vlgmr.msra.gmra.mxu0 %vm1098_vm8, %v1074_v61  ;;  %2162 = vmatmul.msk.f32.vlgmr.msra.gmra.mxu2 %vm1098_vm8, %v1074_v61  ;;  %v1358_v61 = vld [vmem:[%s3887_s5 + $0x2c0] sm:$0xff]  ;;  %v1345_v60 = vld [vmem:[%s3887_s5 + $0x258] sm:$0xff] }
 0x1fc   : > { %1442 = vmatpush.msra.mxu3 %v1358_v61  ;;  %v1375_v61 = vld [vmem:[%s3887_s5 + $0x348] sm:$0xf] }
 0x200   : > { %v1070_v62 = vpop.f32.mrf.mxu2 }
 0x201   : > { %v1076_v63 = vmax.f32 %v1015_v24, %v1070_v62  ;;  %v1274_v62 = vld [vmem:[%s3887_s5 + $0x20] sm:$0xff] }
 0x202   : > { %1406 = vmatpush.msrb.mxu0 %v1274_v62 }
 0x203   : > { %2140 = vmatmul.msk.f32.gmra.mxu0 %vm1098_vm8, %v1076_v63  ;;  %2163 = vmatmul.msk.f32.gmra.mxu2 %vm1098_vm8, %v1076_v63  ;;  %v1312_v63 = vld [vmem:[%s3887_s5 + $0x150] sm:$0xff] }
 0x204   : > { %1426 = vmatpush.msrb.mxu2 %v1312_v63  ;;  %v1343_v63 = vld [vmem:[%s3887_s5 + $0x248] sm:$0xff] }
 0x24a   : > { %v1190_v1 = vpop.f32.mrf.mxu1 }
 0x250   : > { %v1122_v59 = vpop.f32.mrf.mxu3 }
 0x252   : > { %v1193_v15 = vpop.f32.mrf.mxu1 }
 0x258   : > { %v1125_v9 = vpop.f32.mrf.mxu3 }
 0x278   : > { %v1145_v0 = vpop.f32.mrf.mxu0 }
 0x279   : > { %v1146_v30 = vadd.f32 %v1145_v0, %v1122_v59  ;;  %v1327_v59 = vld [vmem:[%s3887_s5 + $0x1c8] sm:$0xff]  ;;  %v1272_v0 = vld [vmem:[%s3887_s5 + $0x10] sm:$0xff] }
 0x27a   : > { %1511 = vmatpush.msrb.mxu1 %v1327_v59  ;;  %1407 = vmatpush.msrb.mxu0 %v1272_v0  ;;  %v1373_v0 = vld [vmem:[%s3887_s5 + $0x338] sm:$0xff] }
 0x27c   : > { %1512 = vmatpush.msrb.mxu1 %v1325_v11 }
 0x27e   : > { %v1213_v5 = vpop.f32.mrf.mxu2  ;;  %1513 = vmatpush.msrb.mxu1 %v1323_v17 }
 0x27f   : > { %v1214_v7 = vadd.f32 %v1213_v5, %v1190_v1  ;;  %v1270_v1 = vld [vmem:[%s3887_s5] sm:$0xff]  ;;  %v1301_v5 = vld [vmem:[%s3887_s5 + $0xf8] sm:$0xff] }
 0x280   : > { %v1148_v10 = vpop.f32.mrf.mxu0  ;;  %1408 = vmatpush.msrb.mxu0 %v1270_v1  ;;  %v1341_v1 = vld [vmem:[%s3887_s5 + $0x238] sm:$0xff] }
 0x281   : > { %v3123_v14 = vmax.f32 %v1146_v30, %v1214_v7  ;;  %v1149_v21 = vadd.f32 %v1148_v10, %v1125_v9  ;;  %v1295_v7 = vld [vmem:[%s3887_s5 + $0xc8] sm:$0xff]  ;;  %v1310_v9 = vld [vmem:[%s3887_s5 + $0x140] sm:$0xff]  ;;  %v1356_v10 = vld [vmem:[%s3887_s5 + $0x2b0] sm:$0xff] }
 0x282   : > { %1485 = vmatpush.msra.mxu0 %v1301_v5  ;;  %v1291_v30 = vld [vmem:[%s3887_s5 + $0xa8] sm:$0xff]  ;;  %1427 = vmatpush.msrb.mxu2 %v1310_v9 }
 0x283   : > { %v1241_v29 = vrot.slane %v3123_v14, 3  ;;  %v1232_v31 = vrot.slane %v3123_v14, 2  ;;  %v1223_v35 = vrot.slane %v3123_v14, 1  ;;  %v1250_v56 = vrot.slane %v3123_v14, 4  ;;  %1443 = vmatpush.msra.mxu3 %v1356_v10  ;;  %v1371_v5 = vld [vmem:[%s3887_s5 + $0x328] sm:$0xff] }
 0x284   : > { %1486 = vmatpush.msra.mxu0 %v1299_v6  ;;  %1428 = vmatpush.msrb.mxu2 %v1308_v12  ;;  %v1335_v9 = vld [vmem:[%s3887_s5 + $0x208] sm:$0xff] }
 0x286   : > { %v1216_v16 = vpop.f32.mrf.mxu2  ;;  %1487 = vmatpush.msra.mxu0 %v1297_v13  ;;  %1429 = vmatpush.msrb.mxu2 %v1306_v18  ;;  %v1339_v13 = vld [vmem:[%s3887_s5 + $0x228] sm:$0xff] }
 0x287   : > { %v1217_v22 = vadd.f32 %v1216_v16, %v1193_v15  ;;  %v1354_v15 = vld [vmem:[%s3887_s5 + $0x2a0] sm:$0xff]  ;;  %v1287_v16 = vld [vmem:[%s3887_s5 + $0x88] sm:$0xff] }
 0x288   : > { %1488 = vmatpush.msra.mxu0 %v1295_v7  ;;  %1444 = vmatpush.msra.mxu3 %v1354_v15  ;;  %v1369_v7 = vld [vmem:[%s3887_s5 + $0x318] sm:$0xff] }
 0x289   : > { %v3144_v27 = vmax.f32 %v1149_v21, %v1217_v22  ;;  %v1285_v21 = vld [vmem:[%s3887_s5 + $0x78] sm:$0xff]  ;;  %1430 = vmatpush.msrb.mxu2 %v1304_v23 }
 0x28a   : > { %1489 = vmatpush.msra.mxu0 %v1293_v8  ;;  %v1321_v22 = vld [vmem:[%s3887_s5 + $0x198] sm:$0xff]  ;;  %1445 = vmatpush.msra.mxu3 %v1352_v19 }
 0x28b   : > { %v1242_v2 = vrot.slane %v3144_v27, 3  ;;  %v1233_v34 = vrot.slane %v3144_v27, 2  ;;  %v1224_v36 = vrot.slane %v3144_v27, 1  ;;  %v1251_v53 = vrot.slane %v3144_v27, 4  ;;  %1514 = vmatpush.msrb.mxu1 %v1321_v22  ;;  %v1337_v8 = vld [vmem:[%s3887_s5 + $0x218] sm:$0xff] }
 0x28c   : > { %1490 = vmatpush.msra.mxu0 %v1291_v30  ;;  %1446 = vmatpush.msra.mxu3 %v1350_v25 }
 0x28d   : > { %v1243_v39 = vsel %vm540_vm2, %v1241_v29, %v1242_v2  ;;  %v1234_v40 = vsel %vm520_vm1, %v1232_v31, %v1233_v34  ;;  %v1225_v41 = vsel %vm500_vm0, %v1223_v35, %v1224_v36  ;;  %v1252_v24 = vsel %vm560_vm3, %v1250_v56, %v1251_v53  ;;  %v1302_v29 = vld [vmem:[%s3887_s5 + $0x100] sm:$0xff]  ;;  %v1348_v31 = vld [vmem:[%s3887_s5 + $0x270] sm:$0xff]  ;;  %1515 = vmatpush.msrb.mxu1 %v1319_v28  ;;  %v1279_v35 = vld [vmem:[%s3887_s5 + $0x48] sm:$0xff] }
 0x28e   : > { %1244 = vrot.lane.b32.xlu1 %v1243_v39, %s3909_s24  ;;  %1235 = vrot.lane.b32.xlu0 %v1234_v40, %s3908_s29  ;;  %v2260_v43 = vpack.i.bf16 %v1224_v36, %v1225_v41  ;;  %v1315_v36 = vld [vmem:[%s3887_s5 + $0x168] sm:$0xff]  ;;  %v1277_v39 = vld [vmem:[%s3887_s5 + $0x38] sm:$0xff]  ;;  %vm1878_vm0 = vcmask 130048   ;;  %vm1978_vm1 = vcmask 982016   ;;  %vm2041_vm2 = vcmask 73728  }
 0x28f   : > { %1491 = vmatpush.msra.mxu0 %v1289_v20  ;;  %1431 = vmatpush.msrb.mxu2 %v1302_v29  ;;  %v1313_v40 = vld [vmem:[%s3887_s5 + $0x158] sm:$0xff]  ;;  %v1334_v56 = vld [vmem:[%s3887_s5 + $0x200] sm:$0xff] }
 0x290   : > { %2261 = vrot.lane.b32.xlu2 %v2260_v43, %s2334_s17  ;;  %1447 = vmatpush.msra.mxu3 %v1348_v31  ;;  %v1361_v41 = vld [vmem:[%s3887_s5 + $0x2d8] sm:$0xff]  ;;  %v1275_v43 = vld [vmem:[%s3887_s5 + $0x28] sm:$0xff]  ;;  %v1376_v28 = vld [vmem:[%s3888_s6] sm:$0x3] }
 0x291   : > { %1492 = vmatpush.msra.mxu0 %v1287_v16  ;;  %1516 = vmatpush.msrb.mxu1 %v1317_v33  ;;  %v1378_v31 = vperm.slane %v1376_v28, 0 }
 0x293   : > { %1493 = vmatpush.msra.mxu0 %v1285_v21  ;;  %1517 = vmatpush.msrb.mxu1 %v1315_v36 }
 0x295   : > { %1494 = vmatpush.msra.mxu0 %v1283_v26  ;;  %1518 = vmatpush.msrb.mxu1 %v1313_v40 }
 0x296   : > { %1246 = vrot.lane.b32.xlu1 %v1242_v2, %s3921_s26  ;;  %1237 = vrot.lane.b32.xlu0 %v1233_v34, %s3922_s20  ;;  %v1365_v2 = vld [vmem:[%s3887_s5 + $0x2f8] sm:$0xff]  ;;  %v1346_v34 = vld [vmem:[%s3887_s5 + $0x260] sm:$0xff] }
 0x297   : > { %1495 = vmatpush.msra.mxu0 %v1281_v32  ;;  %1531 = vmatpush.msra.mxu2 %v1365_v2 }
 0x298   : > { %1253 = vrot.lane.b32.xlu2 %v1252_v24, %s2335_s23  ;;  %1448 = vmatpush.msra.mxu3 %v1346_v34  ;;  %v1347_v24 = vld [vmem:[%s3887_s5 + $0x268] sm:$0xff] }
 0x299   : > { %1496 = vmatpush.msra.mxu0 %v1279_v35  ;;  %1532 = vmatpush.msra.mxu2 %v1363_v37 }
 0x29a   : > { %1449 = vmatpush.msra.mxu3 %v1344_v38  ;;  %1519 = vmatpush.msrb.mxu1 %v1311_v3 }
 0x29b   : > { %1497 = vmatpush.msra.mxu0 %v1277_v39  ;;  %1533 = vmatpush.msra.mxu2 %v1361_v41 }
 0x29c   : > { %1450 = vmatpush.msra.mxu3 %v1342_v42  ;;  %1520 = vmatpush.msrb.mxu1 %v1309_v47 }
 0x29d   : > { %1498 = vmatpush.msra.mxu0 %v1275_v43  ;;  %1534 = vmatpush.msra.mxu2 %v1359_v44 }
 0x29e   : > { %1451 = vmatpush.msra.mxu3 %v1340_v45  ;;  %1521 = vmatpush.msrb.mxu1 %v1307_v51  ;;  %v1379_v45 = vperm.slane %v1376_v28, 1  ;;  %v2174_v51 = vld [vmem:[%s3889_s7 + $0x8] sm:$0x1f]  ;;  %v1683_v28 = vld [vmem:[%s3890_s8 + $0x18] sm:$0xff] }
 0x29f   : > { %1499 = vmatpush.msra.mxu0 %v1273_v46  ;;  %1535 = vmatpush.msra.mxu2 %v1357_v48 }
 0x2a0   : > { %1255 = vrot.lane.b32.xlu2 %v1251_v53, %s2335_s23  ;;  %1452 = vmatpush.msra.mxu3 %v1338_v49  ;;  %v1336_v53 = vld [vmem:[%s3887_s5 + $0x210] sm:$0xff] }
 0x2a1   : > { %1500 = vmatpush.msra.mxu0 %v1271_v50  ;;  %1536 = vmatpush.msra.mxu2 %v1355_v52  ;;  %v1581_v50 = vld [vmem:[%s3889_s7] sm:$0x1f] }
 0x2a2   : > { %1453 = vmatpush.msra.mxu3 %v1336_v53  ;;  %1522 = vmatpush.msrb.mxu1 %v1305_v54  ;;  %v1695_v53 = vld [vmem:[%s3890_s8 + $0x78] sm:$0xff] }
 0x2a3   : > { %1537 = vmatpush.msra.mxu2 %v1353_v55  ;;  %v2195_v54 = vld [vmem:[%s3890_s8 + $0x118] sm:$0xff] }
 0x2a4   : > { %1454 = vmatpush.msra.mxu3 %v1334_v56  ;;  %1523 = vmatpush.msrb.mxu1 %v1303_v4  ;;  %v1694_v4 = vld [vmem:[%s3890_s8 + $0x70] sm:$0xff] }
 0x2a5   : > { %1538 = vmatpush.msra.mxu2 %v1351_v57  ;;  %v2194_v57 = vld [vmem:[%s3890_s8 + $0x110] sm:$0xff] }
 0x2a6   : > { %2167 = vmatpush.msk.msrb.mxu3 %vm560_vm3, %v1375_v61  ;;  %v2193_v61 = vld [vmem:[%s3890_s8 + $0x108] sm:$0xff] }
 0x2a7   : > { %1539 = vmatpush.msra.mxu2 %v1349_v58 }
 0x2a8   : > { %1566 = vmatpush.msrb.mxu3 %v1373_v0  ;;  %v1692_v0 = vld [vmem:[%s3890_s8 + $0x60] sm:$0xff] }
 0x2a9   : > { %1540 = vmatpush.msra.mxu2 %v1347_v24 }
 0x2aa   : > { %1567 = vmatpush.msrb.mxu3 %v1371_v5 }
 0x2ab   : > { %1541 = vmatpush.msra.mxu2 %v1345_v60  ;;  %v1693_v60 = vld [vmem:[%s3890_s8 + $0x68] sm:$0xff] }
 0x2ac   : > { %1568 = vmatpush.msrb.mxu3 %v1369_v7  ;;  %v2191_v7 = vld [vmem:[%s3890_s8 + $0xf8] sm:$0xff] }
 0x2ad   : > { %1542 = vmatpush.msra.mxu2 %v1343_v63 }
 0x2af   : > { %1543 = vmatpush.msra.mxu2 %v1341_v1  ;;  %v2192_v1 = vld [vmem:[%s3890_s8 + $0x100] sm:$0xff] }
 0x2b1   : > { %1544 = vmatpush.msra.mxu2 %v1339_v13  ;;  %v1691_v13 = vld [vmem:[%s3890_s8 + $0x58] sm:$0xff] }
 0x2b3   : > { %1545 = vmatpush.msra.mxu2 %v1337_v8 }
 0x2b5   : > { %1546 = vmatpush.msra.mxu2 %v1335_v9  ;;  %v1690_v9 = vld [vmem:[%s3890_s8 + $0x50] sm:$0xff] }
 0x2ea   : > { %v2262_v62 = vpop.permute.xlu2 %2261 }
 0x2eb   : > { %v2263_v59 = vunpack.i.l.bf16 %v2262_v62  ;;  %v2264_v30 = vunpack.i.h.bf16 %v2262_v62 }
 0x2ed   : > { %v1260_v6 = vsel %vm1259_vm9, %v3123_v14, %v2263_v59  ;;  %v1367_v14 = vld [vmem:[%s3887_s5 + $0x308] sm:$0xff]  ;;  %v1261_v20 = vsel %vm1259_vm9, %v3144_v27, %v2264_v30 }
 0x2ee   : > { %1409 = vmatmul.f32.vlgmr.msrb.gmra.mxu0 %v1260_v6  ;;  %1569 = vmatpush.msrb.mxu3 %v1367_v14 }
 0x2f2   : > { %v1254_v10 = vpop.permute.xlu2 %1253 }
 0x2f3   : > { %2165 = vmatmul.msk.f32.vlgmr.msra.gmra.mxu1 %vm1382_vm10, %v1254_v10 }
 0x2f6   : > { %1412 = vmatmul.f32.gmra.mxu0 %v1261_v20 }
 0x2fa   : > { %v1256_v11 = vpop.permute.xlu2 %1255 }
 0x2fb   : > { %2166 = vmatmul.msk.f32.gmra.mxu1 %vm1382_vm10, %v1256_v11 }
 0x2fe   : > { %1501 = vmatmul.f32.vlgmr.msra.gmra.mxu0 %v1260_v6 }
 0x300   : > { %v1245_v12 = vpop.permute.xlu1 %1244  ;;  %v1236_v15 = vpop.permute.xlu0 %1235 }
 0x301   : > { %v1268_v16 = vsel %vm1267_vm11, %v1245_v12, %v1254_v10  ;;  %v1262_v17 = vsel %vm1098_vm8, %v2263_v59, %v1236_v15  ;;  %v2199_v15 = vld [vmem:[%s3890_s8 + $0x138] sm:$0xff] }
 0x302   : > { %1455 = vmatmul.f32.vlgmr.msra.gmra.mxu3 %v1268_v16  ;;  %v1265_v18 = vsel %vm1264_vm12, %v1262_v17, %v1245_v12  ;;  %v2189_v12 = vld [vmem:[%s3890_s8 + $0xe8] sm:$0xff]  ;;  %v2188_v17 = vld [vmem:[%s3890_s8 + $0xe0] sm:$0xff] }
 0x303   : > { %1432 = vmatmul.f32.vlgmr.msrb.gmra.mxu2 %v1265_v18  ;;  %1524 = vmatmul.f32.vlgmr.msrb.gmra.mxu1 %v1265_v18  ;;  %v2198_v18 = vld [vmem:[%s3890_s8 + $0x130] sm:$0xff] }
 0x306   : > { %1504 = vmatmul.f32.gmra.mxu0 %v1261_v20 }
 0x308   : > { %v1247_v19 = vpop.permute.xlu1 %1246  ;;  %v1238_v27 = vpop.permute.xlu0 %1237 }
 0x309   : > { %v1263_v21 = vsel %vm1098_vm8, %v2264_v30, %v1238_v27  ;;  %v1269_v22 = vsel %vm1267_vm11, %v1247_v19, %v1256_v11  ;;  %v2187_v27 = vld [vmem:[%s3890_s8 + $0xd8] sm:$0xff] }
 0x30a   : > { %1458 = vmatmul.f32.gmra.mxu3 %v1269_v22  ;;  %v1266_v23 = vsel %vm1264_vm12, %v1263_v21, %v1247_v19  ;;  %v1687_v19 = vld [vmem:[%s3890_s8 + $0x38] sm:$0xff]  ;;  %v1686_v21 = vld [vmem:[%s3890_s8 + $0x30] sm:$0xff] }
 0x30b   : > { %1435 = vmatmul.f32.gmra.mxu2 %v1266_v23  ;;  %1527 = vmatmul.f32.gmra.mxu1 %v1266_v23  ;;  %v1685_v23 = vld [vmem:[%s3890_s8 + $0x28] sm:$0xff] }
 0x312   : > { %2168 = vmatmul.msk.f32.vlgmr.msrb.gmra.mxu3 %vm1382_vm10, %v1254_v10  ;;  %v2190_v10 = vld [vmem:[%s3890_s8 + $0xf0] sm:$0xff] }
 0x313   : > { %1547 = vmatmul.f32.vlgmr.msra.gmra.mxu2 %v1268_v16  ;;  %v1688_v16 = vld [vmem:[%s3890_s8 + $0x40] sm:$0xff] }
 0x31a   : > { %2169 = vmatmul.msk.f32.gmra.mxu3 %vm1382_vm10, %v1256_v11  ;;  %v1689_v11 = vld [vmem:[%s3890_s8 + $0x48] sm:$0xff] }
 0x31b   : > { %1550 = vmatmul.f32.gmra.mxu2 %v1269_v22  ;;  %v2186_v22 = vld [vmem:[%s3890_s8 + $0xd0] sm:$0xff] }
 0x36b   : > { %v1410_v25 = vpop.f32.mrf.mxu0 }
 0x36c   : > { %v1411_v34 = vadd.f32 %v1410_v25, %v1378_v31  ;;  %v2185_v25 = vld [vmem:[%s3890_s8 + $0xc8] sm:$0xff] }
 0x370   : > { %v1479_v26 = vpop.f32.mrf.mxu1 }
 0x373   : > { %v1413_v29 = vpop.f32.mrf.mxu0 }
 0x374   : > { %v1414_v36 = vadd.f32 %v1413_v29, %v1378_v31  ;;  %v1682_v29 = vld [vmem:[%s3890_s8 + $0x10] sm:$0xff]  ;;  %v1681_v31 = vld [vmem:[%s3890_s8 + $0x8] sm:$0xff] }
 0x378   : > { %v1482_v33 = vpop.f32.mrf.mxu1 }
 0x37b   : > { %v1502_v38 = vpop.f32.mrf.mxu0 }
 0x37c   : > { %v1503_v55 = vadd.f32 %v1502_v38, %v1379_v45  ;;  %v1697_v38 = vld [vmem:[%s3890_s8 + $0x88] sm:$0xff] }
 0x380   : > { %v1525_v42 = vpop.f32.mrf.mxu1 }
 0x381   : > { %v1526_v58 = vadd.f32 %v1525_v42, %v1503_v55  ;;  %v2180_v42 = vld [vmem:[%s3890_s8 + $0xa0] sm:$0xff] }
 0x382   : > { %v1839_v55 = vld [vmem:[%s3891_s9 + $0x60] sm:$0xff] }
 0x383   : > { %v1505_v52 = vpop.f32.mrf.mxu0 }
 0x384   : > { %v1506_v24 = vadd.f32 %v1505_v52, %v1379_v45  ;;  %v1840_v52 = vld [vmem:[%s3891_s9 + $0x68] sm:$0xff] }
 0x385   : > { %v1456_v32 = vpop.f32.mrf.mxu3 }
 0x386   : > { %v1433_v2 = vpop.f32.mrf.mxu2 }
 0x387   : > { %v1434_v35 = vadd.f32 %v1433_v2, %v1411_v34  ;;  %v1699_v2 = vld [vmem:[%s3890_s8 + $0x98] sm:$0xff] }
 0x388   : > { %v1528_v56 = vpop.f32.mrf.mxu1  ;;  %v2183_v34 = vld [vmem:[%s3890_s8 + $0xb8] sm:$0xff] }
 0x389   : > { %v1457_v40 = vadd.f32 %v1456_v32, %v1434_v35  ;;  %v1529_v62 = vadd.f32 %v1528_v56, %v1506_v24  ;;  %v2184_v32 = vld [vmem:[%s3890_s8 + $0xc0] sm:$0xff]  ;;  %v1698_v35 = vld [vmem:[%s3890_s8 + $0x90] sm:$0xff]  ;;  %v1854_v24 = vld [vmem:[%s3891_s9 + $0xd8] sm:$0xff] }
 0x38a   : > { %v1855_v56 = vld [vmem:[%s3891_s9 + $0xe0] sm:$0xff] }
 0x38b   : > { %v1480_v44 = vadd.f32 %v1479_v26, %v1457_v40  ;;  %v1684_v26 = vld [vmem:[%s3890_s8 + $0x20] sm:$0xff] }
 0x38c   : > { %v2196_v40 = vld [vmem:[%s3890_s8 + $0x120] sm:$0xff] }
 0x38d   : > { %v1459_v37 = vpop.f32.mrf.mxu3  ;;  %v1577_v49 = vmax.f32 %v1480_v44, 0.0 }
 0x38e   : > { %v1436_v39 = vpop.f32.mrf.mxu2 }
 0x38f   : > { %v1437_v41 = vadd.f32 %v1436_v39, %v1414_v36  ;;  %v2182_v36 = vld [vmem:[%s3890_s8 + $0xb0] sm:$0xff]  ;;  %v2181_v39 = vld [vmem:[%s3890_s8 + $0xa8] sm:$0xff] }
 0x391   : > { %v1460_v43 = vadd.f32 %v1459_v37, %v1437_v41  ;;  %v2197_v37 = vld [vmem:[%s3890_s8 + $0x128] sm:$0xff]  ;;  %v1696_v41 = vld [vmem:[%s3890_s8 + $0x80] sm:$0xff] }
 0x393   : > { %v1483_v3 = vadd.f32 %v1482_v33, %v1460_v43  ;;  %v1680_v33 = vld [vmem:[%s3890_s8] sm:$0xff] }
 0x395   : > { %v1579_v46 = vmax.f32 %v1483_v3, 0.0  ;;  %v1571_v47 = vpop.f32.mrf.mxu3 }
 0x396   : > { %v1548_v48 = vpop.f32.mrf.mxu2 }
 0x397   : > { %2170 = vmatpush.msk.msra.mxu3 %vm1586_vm13, %v1579_v46  ;;  %2175 = vmatpush.msk.msra.mxu1 %vm1586_vm13, %v1579_v46  ;;  %v1549_v63 = vadd.f32 %v1548_v48, %v1526_v58  ;;  %v1842_v48 = vld [vmem:[%s3891_s9 + $0x78] sm:$0xff] }
 0x398   : > { %v1838_v58 = vld [vmem:[%s3891_s9 + $0x58] sm:$0xff] }
 0x399   : > { %1608 = vmatpush.msra.mxu3 %v1577_v49  ;;  %1653 = vmatpush.msra.mxu1 %v1577_v49  ;;  %v1572_v8 = vadd.f32 %v1571_v47, %v1549_v63  ;;  %v1858_v49 = vld [vmem:[%s3891_s9 + $0xf8] sm:$0xff] }
 0x39a   : > { %2171 = vmatmul.msk.f32.vlgmr.msra.gmra.mxu3 %vm1582_vm14, %v1581_v50  ;;  %2176 = vmatmul.msk.f32.vlgmr.msra.gmra.mxu1 %vm1582_vm14, %v2174_v51  ;;  %v1870_v63 = vld [vmem:[%s3891_s9 + $0x158] sm:$0xff] }
 0x39b   : > { %1703 = vmatpush.msrb.mxu3 %v1695_v53  ;;  %1764 = vmatpush.msrb.mxu1 %v2195_v54  ;;  %v1578_v20 = vmax.f32 %v1572_v8, 0.0  ;;  %v1856_v53 = vld [vmem:[%s3891_s9 + $0xe8] sm:$0xff]  ;;  %v1874_v54 = vld [vmem:[%s3891_s9 + $0x178] sm:$0xff] }
 0x39c   : > { %v1850_v8 = vld [vmem:[%s3891_s9 + $0xb8] sm:$0xff] }
 0x39d   : > { %1704 = vmatpush.msrb.mxu3 %v1694_v4  ;;  %1765 = vmatpush.msrb.mxu1 %v2194_v57  ;;  %v1574_v6 = vpop.f32.mrf.mxu3  ;;  %v1873_v4 = vld [vmem:[%s3891_s9 + $0x170] sm:$0xff]  ;;  %v1872_v57 = vld [vmem:[%s3891_s9 + $0x168] sm:$0xff] }
 0x39e   : > { %v1551_v59 = vpop.f32.mrf.mxu2 }
 0x39f   : > { %v1552_v5 = vadd.f32 %v1551_v59, %v1529_v62  ;;  %1705 = vmatpush.msrb.mxu3 %v1693_v60  ;;  %1766 = vmatpush.msrb.mxu1 %v2193_v61  ;;  %v1871_v60 = vld [vmem:[%s3891_s9 + $0x160] sm:$0xff]  ;;  %v1837_v61 = vld [vmem:[%s3891_s9 + $0x50] sm:$0xff]  ;;  %v1836_v59 = vld [vmem:[%s3891_s9 + $0x48] sm:$0xff] }
 0x3a0   : > { %v1853_v62 = vld [vmem:[%s3891_s9 + $0xd0] sm:$0xff] }
 0x3a1   : > { %v1575_v14 = vadd.f32 %v1574_v6, %v1552_v5  ;;  %1706 = vmatpush.msrb.mxu3 %v1692_v0  ;;  %1767 = vmatpush.msrb.mxu1 %v2192_v1  ;;  %v1852_v0 = vld [vmem:[%s3891_s9 + $0xc8] sm:$0xff]  ;;  %v1869_v1 = vld [vmem:[%s3891_s9 + $0x150] sm:$0xff]  ;;  %v1835_v5 = vld [vmem:[%s3891_s9 + $0x40] sm:$0xff] }
 0x3a2   : > { %v1851_v6 = vld [vmem:[%s3891_s9 + $0xc0] sm:$0xff] }
 0x3a3   : > { %v1580_v30 = vmax.f32 %v1575_v14, 0.0  ;;  %1707 = vmatpush.msrb.mxu3 %v1691_v13  ;;  %1768 = vmatpush.msrb.mxu1 %v2191_v7  ;;  %v1868_v13 = vld [vmem:[%s3891_s9 + $0x148] sm:$0xff]  ;;  %v1834_v7 = vld [vmem:[%s3891_s9 + $0x38] sm:$0xff] }
 0x3a5   : > { %2172 = vmatpush.msk.msrb.mxu0 %vm1586_vm13, %v1580_v30  ;;  %2177 = vmatpush.msk.msrb.mxu2 %vm1586_vm13, %v1580_v30 }
 0x3a6   : > { %1708 = vmatpush.msrb.mxu3 %v1690_v9  ;;  %1769 = vmatpush.msrb.mxu1 %v2190_v10  ;;  %v1867_v9 = vld [vmem:[%s3891_s9 + $0x140] sm:$0xff]  ;;  %v1833_v10 = vld [vmem:[%s3891_s9 + $0x30] sm:$0xff] }
 0x3a7   : > { %1628 = vmatpush.msrb.mxu0 %v1578_v20  ;;  %1673 = vmatpush.msrb.mxu2 %v1578_v20  ;;  %v1849_v20 = vld [vmem:[%s3891_s9 + $0xb0] sm:$0xff] }
 0x3a8   : > { %2178 = vmatmul.msk.f32.vlgmr.msrb.gmra.mxu2 %vm1582_vm14, %v2174_v51  ;;  %2173 = vmatmul.msk.f32.vlgmr.msrb.gmra.mxu0 %vm1582_vm14, %v1581_v50  ;;  %v1841_v50 = vld [vmem:[%s3891_s9 + $0x70] sm:$0xff] }
 0x3a9   : > { %1709 = vmatpush.msrb.mxu3 %v1689_v11  ;;  %1770 = vmatpush.msrb.mxu1 %v2189_v12  ;;  %v1857_v51 = vld [vmem:[%s3891_s9 + $0xf0] sm:$0xff] }
 0x3aa   : > { %1796 = vmatpush.msra.mxu2 %v2199_v15  ;;  %1735 = vmatpush.msra.mxu0 %v1699_v2  ;;  %v1866_v15 = vld [vmem:[%s3891_s9 + $0x138] sm:$0xff]  ;;  %v1845_v2 = vld [vmem:[%s3891_s9 + $0x90] sm:$0xff] }
 0x3ab   : > { %1710 = vmatpush.msrb.mxu3 %v1688_v16  ;;  %1771 = vmatpush.msrb.mxu1 %v2188_v17 }
 0x3ac   : > { %1797 = vmatpush.msra.mxu2 %v2198_v18  ;;  %1736 = vmatpush.msra.mxu0 %v1698_v35  ;;  %v1832_v18 = vld [vmem:[%s3891_s9 + $0x28] sm:$0xff] }
 0x3ad   : > { %1711 = vmatpush.msrb.mxu3 %v1687_v19  ;;  %1772 = vmatpush.msrb.mxu1 %v2187_v27  ;;  %v1848_v19 = vld [vmem:[%s3891_s9 + $0xa8] sm:$0xff] }
 0x3ae   : > { %1798 = vmatpush.msra.mxu2 %v2197_v37  ;;  %1737 = vmatpush.msra.mxu0 %v1697_v38  ;;  %v1864_v35 = vld [vmem:[%s3891_s9 + $0x128] sm:$0xff]  ;;  %v1827_v37 = vld [vmem:[%s3891_s9] sm:$0xff] }
 0x3af   : > { %1712 = vmatpush.msrb.mxu3 %v1686_v21  ;;  %1773 = vmatpush.msrb.mxu1 %v2186_v22  ;;  %v1831_v21 = vld [vmem:[%s3891_s9 + $0x20] sm:$0xff] }
 0x3b0   : > { %1799 = vmatpush.msra.mxu2 %v2196_v40  ;;  %1738 = vmatpush.msra.mxu0 %v1696_v41  ;;  %v1847_v22 = vld [vmem:[%s3891_s9 + $0xa0] sm:$0xff]  ;;  %v1862_v40 = vld [vmem:[%s3891_s9 + $0x118] sm:$0xff]  ;;  %v1861_v41 = vld [vmem:[%s3891_s9 + $0x110] sm:$0xff] }
 0x3b1   : > { %1713 = vmatpush.msrb.mxu3 %v1685_v23  ;;  %1774 = vmatpush.msrb.mxu1 %v2185_v25  ;;  %v1863_v38 = vld [vmem:[%s3891_s9 + $0x120] sm:$0xff] }
 0x3b2   : > { %1881 = vmatpush.msrb.mxu0 %v1842_v48  ;;  %1901 = vmatpush.msrb.mxu2 %v1858_v49  ;;  %v1973_v48 = vld [vmem:[%s3893_s11 + $0x58] sm:$0xff] }
 0x3b3   : > { %1714 = vmatpush.msrb.mxu3 %v1684_v26  ;;  %1775 = vmatpush.msrb.mxu1 %v2184_v32  ;;  %v1829_v32 = vld [vmem:[%s3891_s9 + $0x10] sm:$0xff] }
 0x3b4   : > { %1882 = vmatpush.msrb.mxu0 %v1841_v50  ;;  %1902 = vmatpush.msrb.mxu2 %v1857_v51 }
 0x3b5   : > { %1715 = vmatpush.msrb.mxu3 %v1683_v28  ;;  %1776 = vmatpush.msrb.mxu1 %v2183_v34  ;;  %v1830_v28 = vld [vmem:[%s3891_s9 + $0x18] sm:$0xff]  ;;  %v1828_v34 = vld [vmem:[%s3891_s9 + $0x8] sm:$0xff] }
 0x3b6   : > { %1883 = vmatpush.msrb.mxu0 %v1840_v52  ;;  %1903 = vmatpush.msrb.mxu2 %v1856_v53 }
 0x3b7   : > { %1716 = vmatpush.msrb.mxu3 %v1682_v29  ;;  %1777 = vmatpush.msrb.mxu1 %v2182_v36  ;;  %v1844_v36 = vld [vmem:[%s3891_s9 + $0x88] sm:$0xff] }
 0x3b8   : > { %1884 = vmatpush.msrb.mxu0 %v1839_v55  ;;  %1904 = vmatpush.msrb.mxu2 %v1855_v56 }
 0x3b9   : > { %1717 = vmatpush.msrb.mxu3 %v1681_v31  ;;  %1778 = vmatpush.msrb.mxu1 %v2181_v39  ;;  %v1846_v31 = vld [vmem:[%s3891_s9 + $0x98] sm:$0xff]  ;;  %v1843_v39 = vld [vmem:[%s3891_s9 + $0x80] sm:$0xff] }
 0x3ba   : > { %1885 = vmatpush.msrb.mxu0 %v1838_v58  ;;  %1905 = vmatpush.msrb.mxu2 %v1854_v24  ;;  %v1970_v58 = vld [vmem:[%s3893_s11 + $0x40] sm:$0xff]  ;;  %v1969_v24 = vld [vmem:[%s3893_s11 + $0x38] sm:$0xff] }
 0x3bb   : > { %1718 = vmatpush.msrb.mxu3 %v1680_v33  ;;  %1779 = vmatpush.msrb.mxu1 %v2180_v42  ;;  %v1865_v33 = vld [vmem:[%s3891_s9 + $0x130] sm:$0xff]  ;;  %v1860_v42 = vld [vmem:[%s3891_s9 + $0x108] sm:$0xff] }
 0x3bc   : > { %1886 = vmatpush.msrb.mxu0 %v1837_v61  ;;  %1906 = vmatpush.msrb.mxu2 %v1853_v62  ;;  %v1967_v61 = vld [vmem:[%s3893_s11 + $0x28] sm:$0xff]  ;;  %v1966_v62 = vld [vmem:[%s3893_s11 + $0x20] sm:$0xff] }
 0x3bd   : > { %1921 = vmatpush.msra.mxu3 %v1874_v54 }
 0x3be   : > { %1887 = vmatpush.msrb.mxu0 %v1836_v59  ;;  %1907 = vmatpush.msrb.mxu2 %v1852_v0  ;;  %v1964_v59 = vld [vmem:[%s3893_s11 + $0x10] sm:$0xff]  ;;  %v1963_v0 = vld [vmem:[%s3893_s11 + $0x8] sm:$0xff] }
 0x3bf   : > { %1922 = vmatpush.msra.mxu3 %v1873_v4  ;;  %v1972_v4 = vld [vmem:[%s3893_s11 + $0x50] sm:$0xff] }
 0x3c0   : > { %1888 = vmatpush.msrb.mxu0 %v1835_v5  ;;  %1908 = vmatpush.msrb.mxu2 %v1851_v6  ;;  %v2013_v5 = vld [vmem:[%s3895_s13 + $0x50] sm:$0xf]  ;;  %v2012_v6 = vld [vmem:[%s3895_s13 + $0x48] sm:$0xff] }
 0x3c1   : > { %1923 = vmatpush.msra.mxu3 %v1872_v57  ;;  %v1971_v57 = vld [vmem:[%s3893_s11 + $0x48] sm:$0xff] }
 0x3c2   : > { %1889 = vmatpush.msrb.mxu0 %v1834_v7  ;;  %1909 = vmatpush.msrb.mxu2 %v1850_v8  ;;  %v2010_v7 = vld [vmem:[%s3895_s13 + $0x38] sm:$0xff]  ;;  %v2009_v8 = vld [vmem:[%s3895_s13 + $0x30] sm:$0xff] }
 0x3c3   : > { %1924 = vmatpush.msra.mxu3 %v1871_v60  ;;  %v1968_v60 = vld [vmem:[%s3893_s11 + $0x30] sm:$0xff] }
 0x3c4   : > { %1890 = vmatpush.msrb.mxu0 %v1833_v10  ;;  %1910 = vmatpush.msrb.mxu2 %v1849_v20  ;;  %v1877_v10 = vld [vmem:[%s3892_s10] sm:$0x1] }
 0x3c5   : > { %1925 = vmatpush.msra.mxu3 %v1870_v63  ;;  %v1965_v63 = vld [vmem:[%s3893_s11 + $0x18] sm:$0xff] }
 0x3c6   : > { %1891 = vmatpush.msrb.mxu0 %v1832_v18  ;;  %1911 = vmatpush.msrb.mxu2 %v1848_v19 }
 0x3c7   : > { %1926 = vmatpush.msra.mxu3 %v1869_v1  ;;  %v1962_v1 = vld [vmem:[%s3893_s11] sm:$0xff] }
 0x3c8   : > { %1892 = vmatpush.msrb.mxu0 %v1831_v21  ;;  %1912 = vmatpush.msrb.mxu2 %v1847_v22  ;;  %v2005_v21 = vld [vmem:[%s3895_s13 + $0x10] sm:$0xff]  ;;  %v2004_v22 = vld [vmem:[%s3895_s13 + $0x8] sm:$0xff] }
 0x3c9   : > { %1927 = vmatpush.msra.mxu3 %v1868_v13  ;;  %v2011_v13 = vld [vmem:[%s3895_s13 + $0x40] sm:$0xff] }
 0x3ca   : > { %1893 = vmatpush.msrb.mxu0 %v1830_v28  ;;  %1913 = vmatpush.msrb.mxu2 %v1846_v31  ;;  %v2014_v31 = vld [vmem:[%s3896_s14] sm:$0x1] }
 0x3cb   : > { %1928 = vmatpush.msra.mxu3 %v1867_v9  ;;  %v2006_v9 = vld [vmem:[%s3895_s13 + $0x18] sm:$0xff] }
 0x3cc   : > { %1894 = vmatpush.msrb.mxu0 %v1829_v32  ;;  %1914 = vmatpush.msrb.mxu2 %v1845_v2 }
 0x3cd   : > { %1929 = vmatpush.msra.mxu3 %v1866_v15 }
 0x3ce   : > { %1895 = vmatpush.msrb.mxu0 %v1828_v34  ;;  %1915 = vmatpush.msrb.mxu2 %v1844_v36 }
 0x3cf   : > { %1930 = vmatpush.msra.mxu3 %v1865_v33 }
 0x3d0   : > { %1896 = vmatpush.msrb.mxu0 %v1827_v37  ;;  %1916 = vmatpush.msrb.mxu2 %v1843_v39 }
 0x3d1   : > { %1931 = vmatpush.msra.mxu3 %v1864_v35 }
 0x3d3   : > { %1932 = vmatpush.msra.mxu3 %v1863_v38 }
 0x3d5   : > { %1933 = vmatpush.msra.mxu3 %v1862_v40 }
 0x3d7   : > { %1934 = vmatpush.msra.mxu3 %v1861_v41 }
 0x3d9   : > { %1935 = vmatpush.msra.mxu3 %v1860_v42 }
 0x417   : > { %v1655_v43 = vpop.f32.mrf.mxu1 }
 0x41d   : > { %v1610_v3 = vpop.f32.mrf.mxu3 }
 0x41e   : > { %v1678_v44 = vmax.f32 %v1610_v3, %v1655_v43  ;;  %v1876_v43 = vld [vmem:[%s3891_s9 + $0x188] sm:$0xff]  ;;  %v1875_v3 = vld [vmem:[%s3891_s9 + $0x180] sm:$0xff] }
 0x41f   : > { %1955 = vmatpush.msra.mxu1 %v1876_v43 }
 0x420   : > { %1719 = vmatmul.f32.vlgmr.msrb.gmra.mxu3 %v1678_v44  ;;  %1780 = vmatmul.f32.vlgmr.msrb.gmra.mxu1 %v1678_v44  ;;  %v1859_v44 = vld [vmem:[%s3891_s9 + $0x100] sm:$0xff] }
 0x421   : > { %1956 = vmatpush.msra.mxu1 %v1875_v3  ;;  %1936 = vmatpush.msra.mxu3 %v1859_v44 }
 0x423   : > { %2203 = vmatpush.msk.msrb.mxu1 %vm560_vm3, %v2013_v5 }
 0x425   : > { %v1630_v45 = vpop.f32.mrf.mxu0  ;;  %2027 = vmatpush.msrb.mxu1 %v2012_v6 }
 0x427   : > { %2028 = vmatpush.msrb.mxu1 %v2011_v13 }
 0x429   : > { %2029 = vmatpush.msrb.mxu1 %v2010_v7 }
 0x42b   : > { %v1675_v46 = vpop.f32.mrf.mxu2  ;;  %2030 = vmatpush.msrb.mxu1 %v2009_v8 }
 0x42c   : > { %v1679_v47 = vmax.f32 %v1630_v45, %v1675_v46  ;;  %v1976_v45 = vld [vmem:[%s3893_s11 + $0x70] sm:$0xff]  ;;  %v1975_v46 = vld [vmem:[%s3893_s11 + $0x68] sm:$0xff] }
 0x42e   : > { %2200 = vmatmul.msk.f32.vlgmr.msra.gmra.mxu2 %vm578_vm6, %v1679_v47  ;;  %2179 = vmatmul.msk.f32.vlgmr.msra.gmra.mxu0 %vm578_vm6, %v1679_v47  ;;  %v1974_v47 = vld [vmem:[%s3893_s11 + $0x60] sm:$0xff] }
 0x42f   : > { %1983 = vmatpush.msra.mxu0 %v1976_v45 }
 0x431   : > { %1984 = vmatpush.msra.mxu0 %v1975_v46 }
 0x433   : > { %1985 = vmatpush.msra.mxu0 %v1974_v47 }
 0x435   : > { %1986 = vmatpush.msra.mxu0 %v1973_v48 }
 0x437   : > { %1987 = vmatpush.msra.mxu0 %v1972_v4 }
 0x439   : > { %1988 = vmatpush.msra.mxu0 %v1971_v57 }
 0x43b   : > { %1989 = vmatpush.msra.mxu0 %v1970_v58 }
 0x43d   : > { %1990 = vmatpush.msra.mxu0 %v1969_v24 }
 0x43f   : > { %1991 = vmatpush.msra.mxu0 %v1968_v60 }
 0x441   : > { %1992 = vmatpush.msra.mxu0 %v1967_v61 }
 0x443   : > { %1993 = vmatpush.msra.mxu0 %v1966_v62 }
 0x445   : > { %1994 = vmatpush.msra.mxu0 %v1965_v63 }
 0x447   : > { %1995 = vmatpush.msra.mxu0 %v1964_v59 }
 0x449   : > { %1996 = vmatpush.msra.mxu0 %v1963_v0 }
 0x44b   : > { %1997 = vmatpush.msra.mxu0 %v1962_v1 }
 0x49d   : > { %v1781_v11 = vpop.f32.mrf.mxu1 }
 0x4a3   : > { %v1720_v14 = vpop.f32.mrf.mxu3 }
 0x4ab   : > { %v1740_v30 = vpop.f32.mrf.mxu0 }
 0x4ac   : > { %v1741_v16 = vadd.f32 %v1740_v30, %v1720_v14  ;;  %v2008_v14 = vld [vmem:[%s3895_s13 + $0x28] sm:$0xff]  ;;  %v2007_v30 = vld [vmem:[%s3895_s13 + $0x20] sm:$0xff] }
 0x4ad   : > { %2031 = vmatpush.msrb.mxu1 %v2008_v14 }
 0x4af   : > { %2032 = vmatpush.msrb.mxu1 %v2007_v30 }
 0x4b1   : > { %v1801_v12 = vpop.f32.mrf.mxu2  ;;  %2033 = vmatpush.msrb.mxu1 %v2006_v9 }
 0x4b2   : > { %v1802_v17 = vadd.f32 %v1801_v12, %v1781_v11 }
 0x4b3   : > { %2034 = vmatpush.msrb.mxu1 %v2005_v21 }
 0x4b4   : > { %v3691_v27 = vmax.f32 %v1741_v16, %v1802_v17 }
 0x4b5   : > { %2035 = vmatpush.msrb.mxu1 %v2004_v22 }
 0x4b6   : > { %v1810_v23 = vrot.slane %v3691_v27, 2  ;;  %v1806_v25 = vrot.slane %v3691_v27, 1  ;;  %v1814_v26 = vrot.slane %v3691_v27, 3  ;;  %v1818_v29 = vrot.slane %v3691_v27, 4 }
 0x4b8   : > { %1811 = vrot.lane.b32.xlu1 %v1810_v23, %s3919_s0  ;;  %1807 = vrot.lane.b32.xlu0 %v1806_v25, %s2335_s23  ;;  %v2003_v23 = vld [vmem:[%s3895_s13] sm:$0xff]  ;;  %s2052_s23 = scalar_lea.hbm %s3897_s15, %s2438_s22  ;;  %s2285_s0 = scalar_lea.hbm %s3897_s15, 2 }
 0x4b9   : > { %1815 = vrot.lane.b32.xlu2 %v1814_v26, %s2336_s18  ;;  %2036 = vmatpush.msrb.mxu1 %v2003_v23  ;;  %v1977_v25 = vld [vmem:[%s3894_s12] sm:$0x1]  ;;  %s486_s18 = scalar_lea.vmem [#allocation2], %s485_s30  ;;  %s2056_s25 = sshll.u32 %s2052_s23, 4  ;;  %s2057_s25 = int_to_ptr.hbm [resolvable:$true] %s2056_s25 }
 0x4ba   : > { %s2279_s26 = sshra.s32 %s2057_s25, 4  ;;  %s2280_s26 = int_to_ptr.hbm [resolvable:$true] %s2279_s26 }
 0x4bb   : > { %s2281_s20 = scalar_lea.hbm %s2280_s26, 1  ;;  %p2286_p0 = scmp.lt.s32.totalorder %s2280_s26, %s3897_s15 }
 0x4bc   : > { %p2282_p11 = scmp.ne.s32.totalorder %s2280_s26, %s2281_s20  ;;  %p2287_p1 = scmp.lt.s32.totalorder %s2285_s0, %s2281_s20 }
 0x4be   : > { %p2283_p12 = pnand %p2282_p11, %p2455_p5  ;;  %p2288_p2 = por %p2287_p1, %p2286_p0 }
 0x4c0   : > { %1819 = vrot.lane.b32.xlu0 %v1818_v29, %s3923_s27  ;;  %s2054_s27 = sshll.u32 %s486_s18, 4  ;;  %p2284_p13 = pneg %p2283_p12  ;;  %s2055_s27 = int_to_ptr.vmem [resolvable:$true] %s2054_s27 }
 0x4c2   : > { %p2289_p3 = pnand %p2288_p2, %p2284_p13 }
 0x513   : > { %v1816_v51 = vpop.permute.xlu2 %1815 }
 0x52a   : > { %v1812_v49 = vpop.permute.xlu1 %1811  ;;  %v1808_v50 = vpop.permute.xlu0 %1807 }
 0x52b   : > { %v1822_v52 = vsel %vm1267_vm11, %v3691_v27, %v1808_v50  ;;  %v1823_v53 = vsel %vm578_vm6, %v1808_v50, %v1812_v49 }
 0x52c   : > { %1897 = vmatmul.f32.vlgmr.msrb.gmra.mxu0 %v1822_v52  ;;  %v1825_v54 = vsel %vm1824_vm15, %v1823_v53, %v1816_v51 }
 0x52d   : > { %1917 = vmatmul.f32.vlgmr.msrb.gmra.mxu2 %v1825_v54 }
 0x532   : > { %v1820_v55 = vpop.permute.xlu0 %1819 }
 0x533   : > { %v1826_v56 = vsel %vm573_vm5, %v1816_v51, %v1820_v55  ;;  %2201 = vmatmul.msk.f32.vlgmr.msra.gmra.mxu1 %vm1878_vm0, %v1820_v55 }
 0x534   : > { %1937 = vmatmul.f32.vlgmr.msra.gmra.mxu3 %v1826_v56 }
 0x5a9   : > { %v1898_v20 = vpop.f32.mrf.mxu0 }
 0x5aa   : > { %v1899_v12 = vadd.f32 %v1898_v20, %v1877_v10 }
 0x5b0   : > { %v1918_v11 = vpop.f32.mrf.mxu2  ;;  %v1958_v18 = vpop.f32.mrf.mxu1 }
 0x5b1   : > { %v1919_v15 = vadd.f32 %v1918_v11, %v1899_v12 }
 0x5b7   : > { %v1938_v16 = vpop.f32.mrf.mxu3 }
 0x5b8   : > { %v1939_v17 = vadd.f32 %v1938_v16, %v1919_v15 }
 0x5ba   : > { %v1959_v19 = vadd.f32 %v1958_v18, %v1939_v17 }
 0x5bc   : > { %v1961_v27 = vmax.f32 %v1959_v19, 0.0 }
 0x5be   : > { %2202 = vmatmul.msk.f32.vlgmr.msra.gmra.mxu0 %vm1978_vm1, %v1961_v27 }
 0x63b   : > { %v1999_v26 = vpop.f32.mrf.mxu0 }
 0x63c   : > { %v2000_v28 = vadd.f32 %v1999_v26, %v1977_v25 }
 0x63e   : > { %v2002_v29 = vmax.f32 %v2000_v28, 0.0 }
 0x640   : > { %2204 = vmatmul.msk.f32.vlgmr.msrb.gmra.mxu1 %vm1259_vm9, %v2002_v29 }
 0x6bd   : > { %v2038_v32 = vpop.f32.mrf.mxu1 }
 0x6be   : > { %v2039_v33 = vadd.f32 %v2038_v32, %v2014_v31 }
 0x6c0   : > { %2042 = vst.msk [vmem:[%s486_s18] sm:$0x1] %vm2041_vm2, %v2039_v33 }
 0x6c1   : > { %2292 = shalt.err (!%p2289_p3)
}
 0x6c2   : > { %2208 = dma.vmem_to_hbm [thread:$0]  (%p2455_p5), %s2055_s27, 16, %s2057_s25, %s2044_s16  }
 0x6c3 PF: > { %s3924_s30 = sld [smem:[#allocation5_spill]]  ;;  %p2214_p4 = scmp.ge.s32.totalorder %s2327_s21, 2 }
 0x6c5   : > { %p2211_p7 = pnand %p2214_p4, %p2459_p6 }
 0x6c7   : > { %p2212_p8 = pneg %p2211_p7 }
 0x6c9   : > { %s2068_s18 = sand.u32 1, %s3924_s30  }
 0x6ca   : > { %s2069_s22 = scalar_lea.sflag [#allocation3], %s2068_s18 }
 0x6cb   : > { %2310 = dma.done.wait (%p2212_p8), %s2069_s22, 16  }
 0x6cc   : > { %2312 = vsyncadd (%p2212_p8), %s2069_s22, 4294967280  ;;  %s3926_s21 = sld [smem:[#allocation7_spill]]  ;;  %s3929_s18 = smov %s2319_s19 }
 0x6cd   : > { %s3927_s26 = sld [smem:[#allocation6_spill]] }
 0x6ce   : > { %s3928_s20 = sld [smem:[#allocation8_spill]] }
 0x6d2   : > { %p25_p9 = scmp.ge.s32.totalorder %s3926_s21, 4  }
 0x6d3   : > { %s3930_s19 = smov %s3927_s26 }
 0x6d4   :  { %27 = sbr.rel (!%p25_p9) target bundleno = 5 (0x5), region = 119 }
 0x6d9   :  { %2074 = vsyncpa [#allocation3], 1 }
 0x6da   :  { %2076 = vsyncpa [#allocation3 + $0x1], 1 }

</bundles_post_ra>
